<compile_context>
chip_gen: v6e
topology: v6e:2x2x1
jax: 0.10.0
libtpu: 0.0.40
codegen_flags: <defaults>
</compile_context>

<pallas_src>
import math
import functools

import jax
import jax.numpy as jnp
from jax.experimental import pallas as pl
from jax.experimental.pallas import tpu as pltpu

MASK_VALUE = -1e30
LN_EPS = 1e-5
MATMUL_DTYPE = jnp.bfloat16     # MXU operand dtype (accumulation is always f32)
WEIGHT_DTYPE = jnp.bfloat16     # storage dtype of weight matrices
ACT_DTYPE = jnp.bfloat16        # storage dtype of inter-kernel activations


def _vmem_limit_bytes():
    """Per-generation scoped-VMEM budget: ~75% of physical, capped at 100 MiB."""
    try:
        info = pltpu.get_tpu_info()
        cap = getattr(info, "vmem_capacity_bytes", None)
        if cap:
            return int(min(cap * 3 // 4, 100 * 1024 * 1024))
    except Exception:
        pass
    return 48 * 1024 * 1024     # safe everywhere (v7x has 64 MiB physical)


VMEM_LIMIT = _vmem_limit_bytes()


# --------------------------------------------------------------------------- helpers
def _tile(dim, target, aligns):
    """Largest tile <= target that is a multiple of one of `aligns` (tried in order) and
    evenly divides `dim`; falls back to the full dim (always a legal block shape)."""
    if dim <= target:
        return dim
    for a in aligns:
        t = (target // a) * a
        while t >= a:
            if dim % t == 0:
                return t
            t -= a
    return dim


# ------------------------------------------------------------------ fused matmul kernel
def _fused_matmul_kernel(*refs, has_ln, has_pos, has_residual, has_final_ln,
                         apply_relu, single_k):
    it = iter(refs)
    x_ref = next(it)
    w_ref = next(it)
    b_ref = next(it)
    g_ref = bt_ref = p_ref = r_ref = fg_ref = fb_ref = None
    if has_ln:
        g_ref = next(it)
        bt_ref = next(it)
    if has_pos:
        p_ref = next(it)
    if has_residual:
        r_ref = next(it)
    if has_final_ln:
        fg_ref = next(it)
        fb_ref = next(it)
    o_ref = next(it)
    xln_ref = next(it) if has_ln else None          # (tm, K) bf16 scratch
    acc_ref = None if single_k else next(it)        # (tm, tn) f32 scratch

    j_idx = pl.program_id(1)
    k_idx = pl.program_id(2)

    if has_ln:
        # LayerNorm over the full K axis (tk == K, K grid == 1), hoisted: computed once per
        # M-tile (at j == 0) into a bf16 scratch reused by every N-tile of this row block.
        @pl.when(j_idx == 0)
        def _():
            x = x_ref[...].astype(jnp.float32)
            mean = jnp.mean(x, axis=-1, keepdims=True)
            xc = x - mean
            var = jnp.mean(xc * xc, axis=-1, keepdims=True)   # biased (matches torch LN)
            xn = xc * jax.lax.rsqrt(var + LN_EPS) * g_ref[...] + bt_ref[...]
            xln_ref[...] = xn.astype(MATMUL_DTYPE)
        lhs = xln_ref[...]
    else:
        lhs = x_ref[...].astype(MATMUL_DTYPE)

    partial = jnp.dot(lhs, w_ref[...].astype(MATMUL_DTYPE),
                      preferred_element_type=jnp.float32)

    def _epilogue(acc):
        y = acc + b_ref[...]
        if apply_relu:
            y = jnp.maximum(y, 0.0)
        if has_pos:
            y = y + p_ref[...]
        if has_residual:
            y = y + r_ref[...].astype(jnp.float32)
        if has_final_ln:
            mean = jnp.mean(y, axis=-1, keepdims=True)
            yc = y - mean
            var = jnp.mean(yc * yc, axis=-1, keepdims=True)
            y = yc * jax.lax.rsqrt(var + LN_EPS) * fg_ref[...] + fb_ref[...]
        o_ref[...] = y.astype(o_ref.dtype)

    if single_k:
        _epilogue(partial)
    else:
        @pl.when(k_idx == 0)
        def _():
            acc_ref[...] = jnp.zeros_like(acc_ref)

        acc_ref[...] += partial

        @pl.when(k_idx == pl.num_programs(2) - 1)
        def _():
            _epilogue(acc_ref[...])


def fused_matmul(x, w, b, *, ln=None, pos_bias=None, seq_len=None, residual=None,
                 apply_relu=False, final_ln=None, out_dtype=None,
                 tm=512, tn=512, tk=512):
    """o = final_LN( [residual +] [pos_bias +] [relu]( LN(x) @ w + b ) ) — all parts optional."""
    M, K = x.shape
    Kw, N = w.shape
    assert K == Kw
    out_dtype = ACT_DTYPE if out_dtype is None else out_dtype
    has_ln = ln is not None
    has_pos = pos_bias is not None
    has_res = residual is not None
    has_fln = final_ln is not None

    # ---- tile selection -------------------------------------------------------------
    if has_ln and K >= 2048:
        tm = min(tm, 256)            # (tm, K) LN block + bf16 scratch + weight tile budget
    if has_pos:
        assert seq_len is not None and M % seq_len == 0
        tm = _tile(seq_len, tm, (8,))          # tm | seq_len so pos rows repeat per block
    else:
        tm = _tile(M, tm, (8,))
    tn = N if has_fln else _tile(N, tn, (256, 128))   # final LN needs the full output row
    tk = K if has_ln else _tile(K, tk, (256, 128))    # fused LN reduces over the whole K
    single_k = (tk == K)
    grid = (M // tm, N // tn, K // tk)

    # ---- specs / args ---------------------------------------------------------------
    in_specs = [
        pl.BlockSpec((tm, tk), lambda i, j, k: (i, k)),
        pl.BlockSpec((tk, tn), lambda i, j, k: (k, j)),
        pl.BlockSpec((1, tn), lambda i, j, k: (0, j)),
    ]
    args = [x, w, b.reshape(1, N).astype(jnp.float32)]
    if has_ln:
        gamma, beta = ln
        in_specs += [pl.BlockSpec((1, K), lambda i, j, k: (0, 0)),
                     pl.BlockSpec((1, K), lambda i, j, k: (0, 0))]
        args += [gamma.reshape(1, K).astype(jnp.float32),
                 beta.reshape(1, K).astype(jnp.float32)]
    if has_pos:
        rep = seq_len // tm
        in_specs.append(pl.BlockSpec((tm, tn), lambda i, j, k, r=rep: (i % r, j)))
        args.append(pos_bias.astype(jnp.float32))
    if has_res:
        in_specs.append(pl.BlockSpec((tm, tn), lambda i, j, k: (i, j)))
        args.append(residual)
    if has_fln:
        fg, fb = final_ln
        in_specs += [pl.BlockSpec((1, N), lambda i, j, k: (0, 0)),
                     pl.BlockSpec((1, N), lambda i, j, k: (0, 0))]
        args += [fg.reshape(1, N).astype(jnp.float32),
                 fb.reshape(1, N).astype(jnp.float32)]

    scratch_shapes = []
    if has_ln:
        scratch_shapes.append(pltpu.VMEM((tm, K), MATMUL_DTYPE))
    if not single_k:
        scratch_shapes.append(pltpu.VMEM((tm, tn), jnp.float32))

    # With the LN hoist keyed on j == 0, the j sweep must stay sequential per core.
    dims = ("parallel", "arbitrary", "arbitrary") if has_ln \
        else ("parallel", "parallel", "arbitrary")

    out_isz = jnp.dtype(out_dtype).itemsize
    flops = 2 * M * N * K
    bytes_accessed = (M * K * x.dtype.itemsize + K * N * w.dtype.itemsize + N * 4
                      + M * N * out_isz
                      + (M * N * residual.dtype.itemsize if has_res else 0)
                      + (seq_len * N * 4 if has_pos else 0))

    return pl.pallas_call(
        functools.partial(_fused_matmul_kernel, has_ln=has_ln, has_pos=has_pos,
                          has_residual=has_res, has_final_ln=has_fln,
                          apply_relu=apply_relu, single_k=single_k),
        out_shape=jax.ShapeDtypeStruct((M, N), out_dtype),
        grid=grid,
        in_specs=in_specs,
        out_specs=pl.BlockSpec((tm, tn), lambda i, j, k: (i, j)),
        scratch_shapes=scratch_shapes,
        compiler_params=pltpu.CompilerParams(
            dimension_semantics=dims,
            vmem_limit_bytes=VMEM_LIMIT),
        cost_estimate=pl.CostEstimate(flops=flops, transcendentals=0,
                                      bytes_accessed=bytes_accessed),
    )(*args)


# ----------------------------------------------------------------------- attention kernel
def _attn_kernel(qkv_ref, mask_ref, o_ref, acc_ref, *, num_heads):
    # qkv block: (1, L, 3E) packed head-major [q_h | k_h | v_h] per head, Q already scaled
    # by 1/sqrt(hd) at init;  mask block: (1, 1, L) with 1.0 == masked key;
    # out block: (1, L, E);  acc_ref: (L, E) f32 VMEM scratch (one head live at a time,
    # single lane-dense (L, E) store at the end).
    L = qkv_ref.shape[1]
    E = qkv_ref.shape[2] // 3
    hd = E // num_heads

    qkv = qkv_ref[0]                                     # (L, 3E) bf16
    masked = mask_ref[0] > 0.5                           # (1, L) bool, broadcasts over queries

    for h in range(num_heads):                           # static unroll over heads
        base = h * 3 * hd
        qh = qkv[:, base:base + hd].astype(MATMUL_DTYPE)             # (L, hd), pre-scaled
        kh = qkv[:, base + hd:base + 2 * hd].astype(MATMUL_DTYPE)    # (L, hd)
        vh = qkv[:, base + 2 * hd:base + 3 * hd].astype(MATMUL_DTYPE)

        # scores = q @ k^T  (contract on head_dim, no explicit transpose needed)
        s = jax.lax.dot_general(qh, kh, dimension_numbers=(((1,), (1,)), ((), ())),
                                preferred_element_type=jnp.float32)  # (L, L) f32
        s = jnp.where(masked, MASK_VALUE, s)
        s = s - jnp.max(s, axis=-1, keepdims=True)
        p = jnp.exp(s)
        p = p * pl.reciprocal(jnp.sum(p, axis=-1, keepdims=True), approx=True)
        acc_ref[:, h * hd:(h + 1) * hd] = jnp.dot(p.astype(MATMUL_DTYPE), vh,
                                                  preferred_element_type=jnp.float32)

    o_ref[0] = acc_ref[...].astype(o_ref.dtype)          # single dense (L, E) store


def attention(qkv, mask, *, num_heads):
    # qkv: (B, L, 3E) head-major packed projection output;  mask: (B, L), 1.0 = padded key.
    B, L, E3 = qkv.shape
    E = E3 // 3
    mask3 = mask.astype(jnp.float32).reshape(B, 1, L)

    flops = 4 * B * L * L * E
    bytes_accessed = (B * L * E3 * qkv.dtype.itemsize + B * L * 4
                      + B * L * E * jnp.dtype(ACT_DTYPE).itemsize)

    return pl.pallas_call(
        functools.partial(_attn_kernel, num_heads=num_heads),
        out_shape=jax.ShapeDtypeStruct((B, L, E), ACT_DTYPE),
        grid=(B,),
        in_specs=[pl.BlockSpec((1, L, E3), lambda b: (b, 0, 0)),
                  pl.BlockSpec((1, 1, L), lambda b: (b, 0, 0))],
        out_specs=pl.BlockSpec((1, L, E), lambda b: (b, 0, 0)),
        scratch_shapes=[pltpu.VMEM((L, E), jnp.float32)],
        compiler_params=pltpu.CompilerParams(
            dimension_semantics=("parallel",),
            vmem_limit_bytes=VMEM_LIMIT),
        cost_estimate=pl.CostEstimate(flops=flops,
                                      transcendentals=B * num_heads * L * L,
                                      bytes_accessed=bytes_accessed),
    )(qkv, mask3)


# --------------------------------------------------------------------------- model glue
def positional_embedding(length, dim):
    # `length` and `dim` are Python ints at trace time (static), so jnp.arange is concrete.
    half = dim // 2
    freqs = jnp.exp(jnp.arange(half, dtype=jnp.float32) * -(math.log(10000.0) / half))
    ang = jnp.arange(length, dtype=jnp.float32)[:, None] * freqs[None, :]   # (L, half)
    return jnp.concatenate([jnp.sin(ang), jnp.cos(ang)], axis=1)            # (L, dim)


def transformer_layer(p, x2d, mask, *, batch, seq_len, num_heads, final_ln=None):
    E = x2d.shape[1]

    # --- self-attention block (pre-LN); LN1 fused (and hoisted) in the QKV projection ---
    qkv = fused_matmul(x2d, p["qkv_w"], p["qkv_b"], ln=(p["ln1_g"], p["ln1_b"]))
    attn = attention(qkv.reshape(batch, seq_len, 3 * E), mask, num_heads=num_heads)
    # output projection with the residual add fused into the epilogue
    x2d = fused_matmul(attn.reshape(batch * seq_len, E), p["out_w"], p["out_b"],
                       residual=x2d)

    # --- feed-forward block (pre-LN); LN2 + bias + ReLU fused into FC1, residual into FC2;
    #     on the last layer the final encoder LayerNorm is fused into the FC2 epilogue ---
    h = fused_matmul(x2d, p["fc1_w"], p["fc1_b"], ln=(p["ln2_g"], p["ln2_b"]),
                     apply_relu=True)
    x2d = fused_matmul(h, p["fc2_w"], p["fc2_b"], residual=x2d, final_ln=final_ln,
                       out_dtype=jnp.float32 if final_ln is not None else None)
    return x2d


def transformer_encoder(params, x, mask, *, pos_dim, num_heads):
    B, L, Din = x.shape
    E = params["in_b"].shape[0]
    n_layers = len(params["layers"])
    assert n_layers >= 1

    # Input projection.  Instead of materializing cat([x, pos_emb]) in HBM, split the matmul:
    #   cat(x, pe) @ W + b  ==  x @ W_x  +  (pe @ W_pos)  +  b
    # where pe @ W_pos is a tiny (L, E) additive bias computed once in plain JAX and added
    # inside the matmul epilogue (no extra (B, L, E) elementwise pass through HBM).
    pe = positional_embedding(L, pos_dim)                                   # (L, pos_dim)
    pos_bias = pe @ params["in_w_pos"].astype(jnp.float32)                  # (L, E)
    h2d = fused_matmul(x.reshape(B * L, Din), params["in_w_x"], params["in_b"],
                       pos_bias=pos_bias, seq_len=L)

    for li, layer_p in enumerate(params["layers"]):
        fl = (params["ln_g"], params["ln_b"]) if li == n_layers - 1 else None
        h2d = transformer_layer(layer_p, h2d, mask, batch=B, seq_len=L,
                                num_heads=num_heads, final_ln=fl)
    return h2d.reshape(B, L, E)


# ------------------------------------------------------------------------ param init
def _xavier(key, fan_in, fan_out, shape):
    a = math.sqrt(6.0 / (fan_in + fan_out))
    return jax.random.uniform(key, shape, minval=-a, maxval=a, dtype=jnp.float32)


def _pack_qkv_head_major(w_qkv, b_qkv, num_heads, scale):
    """Permute a [Q | K | V] column layout (E, 3E) to head-major [q_h | k_h | v_h] blocks,
    folding the 1/sqrt(head_dim) scaling into the Q columns (and bias)."""
    E = w_qkv.shape[0]
    hd = E // num_heads
    wq, wk, wv = w_qkv[:, :E] * scale, w_qkv[:, E:2 * E], w_qkv[:, 2 * E:]
    bq, bk, bv = b_qkv[:E] * scale, b_qkv[E:2 * E], b_qkv[2 * E:]
    w = jnp.stack([wq.reshape(E, num_heads, hd),
                   wk.reshape(E, num_heads, hd),
                   wv.reshape(E, num_heads, hd)], axis=2).reshape(E, 3 * E)
    b = jnp.stack([bq.reshape(num_heads, hd),
                   bk.reshape(num_heads, hd),
                   bv.reshape(num_heads, hd)], axis=1).reshape(3 * E)
    return w, b


def init_params(key, input_dim, positional_dim, num_layers, embed_dim, num_heads, ffn_emb_dim):
    E, F = embed_dim, ffn_emb_dim
    hd = E // num_heads
    scale = float(hd) ** -0.5
    in_dim = input_dim + positional_dim
    keys = jax.random.split(key, 1 + 4 * num_layers)

    # full xavier init on the (in_dim, E) input projection, then split into x / positional rows
    w_in = _xavier(keys[0], in_dim, E, (in_dim, E))
    params = {
        "in_w_x": w_in[:input_dim].astype(WEIGHT_DTYPE),
        "in_w_pos": w_in[input_dim:].astype(WEIGHT_DTYPE),
        "in_b": jnp.zeros((E,), jnp.float32),
        "ln_g": jnp.ones((E,), jnp.float32),
        "ln_b": jnp.zeros((E,), jnp.float32),
        "layers": [],
    }
    for l in range(num_layers):
        k0, k1, k2, k3 = keys[1 + 4 * l:1 + 4 * (l + 1)]
        # torch proj is (3E, E) used as x @ proj.T; generated here as (E, 3E) cols [Q|K|V],
        # then permuted to head-major with the attention scale folded into Q.
        w_qkv = _xavier(k0, E, 3 * E, (E, 3 * E))
        b_qkv = jnp.zeros((3 * E,), jnp.float32)
        w_qkv, b_qkv = _pack_qkv_head_major(w_qkv, b_qkv, num_heads, scale)
        params["layers"].append({
            "ln1_g": jnp.ones((E,), jnp.float32), "ln1_b": jnp.zeros((E,), jnp.float32),
            "qkv_w": w_qkv.astype(WEIGHT_DTYPE),
            "qkv_b": b_qkv,
            "out_w": _xavier(k1, E, E, (E, E)).astype(WEIGHT_DTYPE),
            "out_b": jnp.zeros((E,), jnp.float32),
            "ln2_g": jnp.ones((E,), jnp.float32), "ln2_b": jnp.zeros((E,), jnp.float32),
            "fc1_w": _xavier(k2, E, F, (E, F)).astype(WEIGHT_DTYPE),
            "fc1_b": jnp.zeros((F,), jnp.float32),
            "fc2_w": _xavier(k3, F, E, (F, E)).astype(WEIGHT_DTYPE),
            "fc2_b": jnp.zeros((E,), jnp.float32),
        })
    return params


# ---------------------------------------------------------------------------- driver
if __name__ == "__main__":
    B, L = 2, 8
    input_dim, positional_dim = 16, 16
    embed_dim, num_heads, ffn_emb_dim, num_layers = 32, 4, 64, 2

    key = jax.random.PRNGKey(0)
    k_param, k_x = jax.random.split(key)
    params = init_params(k_param, input_dim, positional_dim, num_layers,
                         embed_dim, num_heads, ffn_emb_dim)

    x = jax.random.normal(k_x, (B, L, input_dim), dtype=jnp.float32)
    # mask: 1.0 = padded key position (masked out), 0.0 = valid
    mask = jnp.zeros((B, L), dtype=jnp.float32).at[1, 6:].set(1.0)

    fwd = jax.jit(transformer_encoder, static_argnames=("pos_dim", "num_heads"))
    out = fwd(params, x, mask, pos_dim=positional_dim, num_heads=num_heads)
    out = jax.block_until_ready(out)

    assert out.shape == (B, L, embed_dim), out.shape
    assert out.dtype == jnp.float32, out.dtype
    assert bool(jnp.all(jnp.isfinite(out)))
    print("KERNEL_OK")
</pallas_src>

<mosaic_0001>
module attributes {stable_mosaic.version = 11 : i64} {
  func.func @_fused_matmul_kernel(%arg0: i32, %arg1: i32, %arg2: i32, %arg3: memref<8x16xf32, #tpu.memory_space<vmem>>, %arg4: memref<16x32xbf16, #tpu.memory_space<vmem>>, %arg5: memref<1x32xf32, #tpu.memory_space<vmem>>, %arg6: memref<8x32xf32, #tpu.memory_space<vmem>>, %arg7: memref<8x32xbf16, #tpu.memory_space<vmem>>) attributes {dimension_semantics = [#tpu.dimension_semantics<parallel>, #tpu.dimension_semantics<parallel>, #tpu.dimension_semantics<arbitrary>], iteration_bounds = array<i64: 2, 1, 1>, scalar_prefetch = 0 : i64, scratch_operands = 0 : i64, tpu.core_type = #tpu.core_type<tc>, window_params = [{transform_indices = @transform_0, window_bounds = array<i64: 8, 16>}, {transform_indices = @transform_1, window_bounds = array<i64: 16, 32>}, {transform_indices = @transform_2, window_bounds = array<i64: 1, 32>}, {transform_indices = @transform_3, window_bounds = array<i64: 8, 32>}, {transform_indices = @transform_4, window_bounds = array<i64: 8, 32>}]} {
    %c0 = arith.constant 0 : index
    %c0_0 = arith.constant 0 : index
    %0 = vector.load %arg3[%c0, %c0_0] : memref<8x16xf32, #tpu.memory_space<vmem>>, vector<8x16xf32>
    %1 = arith.truncf %0 : vector<8x16xf32> to vector<8x16xbf16>
    %c0_1 = arith.constant 0 : index
    %c0_2 = arith.constant 0 : index
    %2 = vector.load %arg4[%c0_1, %c0_2] : memref<16x32xbf16, #tpu.memory_space<vmem>>, vector<16x32xbf16>
    %cst = arith.constant dense<0.000000e+00> : vector<8x32xf32>
    %3 = tpu.matmul %1, %2, %cst {dimension_numbers = #tpu.dot_dimension_numbers<[1], [0], [0], [1], [0, 0, 1, 1], [], []>} : vector<8x16xbf16>, vector<16x32xbf16>, vector<8x32xf32> -> vector<8x32xf32>
    %c0_3 = arith.constant 0 : index
    %c0_4 = arith.constant 0 : index
    %4 = vector.load %arg5[%c0_3, %c0_4] : memref<1x32xf32, #tpu.memory_space<vmem>>, vector<1x32xf32>
    %5 = vector.broadcast %4 : vector<1x32xf32> to vector<8x32xf32>
    %6 = arith.addf %3, %5 : vector<8x32xf32>
    %c0_5 = arith.constant 0 : index
    %c0_6 = arith.constant 0 : index
    %7 = vector.load %arg6[%c0_5, %c0_6] : memref<8x32xf32, #tpu.memory_space<vmem>>, vector<8x32xf32>
    %8 = arith.addf %6, %7 : vector<8x32xf32>
    %9 = arith.truncf %8 : vector<8x32xf32> to vector<8x32xbf16>
    %c0_7 = arith.constant 0 : index
    %c0_8 = arith.constant 0 : index
    %10 = vector.load %arg7[%c0_7, %c0_8] : memref<8x32xbf16, #tpu.memory_space<vmem>>, vector<8x32xbf16>
    tpu.vector_store %arg7[%c0_7, %c0_8], %9 {strides = array<i32>} : memref<8x32xbf16, #tpu.memory_space<vmem>>, vector<8x32xbf16>,
    return
  }
  func.func @transform_0(%arg0: i32, %arg1: i32, %arg2: i32) -> (i32, i32) {
    %c0_i32 = arith.constant 0 : i32
    return %arg0, %arg2 : i32, i32
  }
  func.func @transform_1(%arg0: i32, %arg1: i32, %arg2: i32) -> (i32, i32) {
    %c0_i32 = arith.constant 0 : i32
    return %arg2, %arg1 : i32, i32
  }
  func.func @transform_2(%arg0: i32, %arg1: i32, %arg2: i32) -> (i32, i32) {
    %c0_i32 = arith.constant 0 : i32
    %c0_i32_0 = arith.constant 0 : i32
    return %c0_i32, %arg1 : i32, i32
  }
  func.func @transform_3(%arg0: i32, %arg1: i32, %arg2: i32) -> (i32, i32) {
    %c1_i32 = arith.constant 1 : i32
    %c0_i32 = arith.constant 0 : i32
    %0 = arith.cmpi eq, %c1_i32, %c0_i32 : i32
    %c1_i32_0 = arith.constant 1 : i32
    %1 = arith.select %0, %c1_i32_0, %c1_i32 : i32
    %2 = arith.remsi %arg0, %1 : i32
    %c0_i32_1 = arith.constant 0 : i32
    %3 = arith.cmpi ne, %2, %c0_i32_1 : i32
    %c0_i32_2 = arith.constant 0 : i32
    %4 = arith.cmpi slt, %2, %c0_i32_2 : i32
    %c0_i32_3 = arith.constant 0 : i32
    %5 = arith.cmpi slt, %1, %c0_i32_3 : i32
    %6 = arith.xori %4, %5 : i1
    %7 = arith.andi %6, %3 : i1
    %8 = arith.addi %2, %1 : i32
    %9 = arith.select %7, %8, %2 : i32
    %c0_i32_4 = arith.constant 0 : i32
    return %9, %arg1 : i32, i32
  }
  func.func @transform_4(%arg0: i32, %arg1: i32, %arg2: i32) -> (i32, i32) {
    %c0_i32 = arith.constant 0 : i32
    return %arg0, %arg1 : i32, i32
  }
}

module attributes {stable_mosaic.version = 11 : i64} {
  func.func @_fused_matmul_kernel(%arg0: i32, %arg1: i32, %arg2: i32, %arg3: memref<16x32xbf16, #tpu.memory_space<vmem>>, %arg4: memref<32x96xbf16, #tpu.memory_space<vmem>>, %arg5: memref<1x96xf32, #tpu.memory_space<vmem>>, %arg6: memref<1x32xf32, #tpu.memory_space<vmem>>, %arg7: memref<1x32xf32, #tpu.memory_space<vmem>>, %arg8: memref<16x96xbf16, #tpu.memory_space<vmem>>, %arg9: memref<16x32xbf16, #tpu.memory_space<vmem>>) attributes {dimension_semantics = [#tpu.dimension_semantics<parallel>, #tpu.dimension_semantics<arbitrary>, #tpu.dimension_semantics<arbitrary>], iteration_bounds = array<i64: 1, 1, 1>, scalar_prefetch = 0 : i64, scratch_operands = 1 : i64, tpu.core_type = #tpu.core_type<tc>, window_params = [{transform_indices = @transform_0, window_bounds = array<i64: 16, 32>}, {transform_indices = @transform_1, window_bounds = array<i64: 32, 96>}, {transform_indices = @transform_2, window_bounds = array<i64: 1, 96>}, {pipeline_mode = #tpu.pipeline_mode<synchronous>, transform_indices = @transform_3, window_bounds = array<i64: 1, 32>}, {pipeline_mode = #tpu.pipeline_mode<synchronous>, transform_indices = @transform_4, window_bounds = array<i64: 1, 32>}, {transform_indices = @transform_5, window_bounds = array<i64: 16, 96>}]} {
    %c0_i32 = arith.constant 0 : i32
    %0 = arith.cmpi eq, %arg1, %c0_i32 : i32
    %1 = arith.extui %0 : i1 to i32
    %c0_i32_0 = arith.constant 0 : i32
    %2 = arith.cmpi ne, %1, %c0_i32_0 : i32
    scf.if %2 {
      %c0_8 = arith.constant 0 : index
      %c0_9 = arith.constant 0 : index
      %11 = vector.load %arg3[%c0_8, %c0_9] : memref<16x32xbf16, #tpu.memory_space<vmem>>, vector<16x32xbf16>
      %12 = arith.extf %11 : vector<16x32xbf16> to vector<16x32xf32>
      %cst_10 = arith.constant dense<0.000000e+00> : vector<16xf32>
      %13 = vector.multi_reduction <add>, %12, %cst_10 [1] : vector<16x32xf32> to vector<16xf32>
      %14 = vector.shape_cast %13 : vector<16xf32> to vector<16x1xf32>
      %cst_11 = arith.constant 3.200000e+01 : f32
      %15 = vector.broadcast %cst_11 : f32 to vector<16x1xf32>
      %16 = arith.divf %14, %15 : vector<16x1xf32>
      %17 = vector.broadcast %16 : vector<16x1xf32> to vector<16x32xf32>
      %18 = arith.subf %12, %17 : vector<16x32xf32>
      %19 = arith.mulf %18, %18 : vector<16x32xf32>
      %cst_12 = arith.constant dense<0.000000e+00> : vector<16xf32>
      %20 = vector.multi_reduction <add>, %19, %cst_12 [1] : vector<16x32xf32> to vector<16xf32>
      %21 = vector.shape_cast %20 : vector<16xf32> to vector<16x1xf32>
      %cst_13 = arith.constant 3.200000e+01 : f32
      %22 = vector.broadcast %cst_13 : f32 to vector<16x1xf32>
      %23 = arith.divf %21, %22 : vector<16x1xf32>
      %cst_14 = arith.constant 9.99999974E-6 : f32
      %24 = vector.broadcast %cst_14 : f32 to vector<16x1xf32>
      %25 = arith.addf %23, %24 : vector<16x1xf32>
      %26 = math.rsqrt %25 : vector<16x1xf32>
      %27 = vector.broadcast %26 : vector<16x1xf32> to vector<16x32xf32>
      %28 = arith.mulf %18, %27 : vector<16x32xf32>
      %c0_15 = arith.constant 0 : index
      %c0_16 = arith.constant 0 : index
      %29 = vector.load %arg6[%c0_15, %c0_16] : memref<1x32xf32, #tpu.memory_space<vmem>>, vector<1x32xf32>
      %30 = vector.broadcast %29 : vector<1x32xf32> to vector<16x32xf32>
      %31 = arith.mulf %28, %30 : vector<16x32xf32>
      %c0_17 = arith.constant 0 : index
      %c0_18 = arith.constant 0 : index
      %32 = vector.load %arg7[%c0_17, %c0_18] : memref<1x32xf32, #tpu.memory_space<vmem>>, vector<1x32xf32>
      %33 = vector.broadcast %32 : vector<1x32xf32> to vector<16x32xf32>
      %34 = arith.addf %31, %33 : vector<16x32xf32>
      %35 = arith.truncf %34 : vector<16x32xf32> to vector<16x32xbf16>
      %c0_19 = arith.constant 0 : index
      %c0_20 = arith.constant 0 : index
      %36 = vector.load %arg9[%c0_19, %c0_20] : memref<16x32xbf16, #tpu.memory_space<vmem>>, vector<16x32xbf16>
      tpu.vector_store %arg9[%c0_19, %c0_20], %35 {strides = array<i32>} : memref<16x32xbf16, #tpu.memory_space<vmem>>, vector<16x32xbf16>,
    } else {
    }
    %c0 = arith.constant 0 : index
    %c0_1 = arith.constant 0 : index
    %3 = vector.load %arg9[%c0, %c0_1] : memref<16x32xbf16, #tpu.memory_space<vmem>>, vector<16x32xbf16>
    %c0_2 = arith.constant 0 : index
    %c0_3 = arith.constant 0 : index
    %4 = vector.load %arg4[%c0_2, %c0_3] : memref<32x96xbf16, #tpu.memory_space<vmem>>, vector<32x96xbf16>
    %cst = arith.constant dense<0.000000e+00> : vector<16x96xf32>
    %5 = tpu.matmul %3, %4, %cst {dimension_numbers = #tpu.dot_dimension_numbers<[1], [0], [0], [1], [0, 0, 1, 1], [], []>} : vector<16x32xbf16>, vector<32x96xbf16>, vector<16x96xf32> -> vector<16x96xf32>
    %c0_4 = arith.constant 0 : index
    %c0_5 = arith.constant 0 : index
    %6 = vector.load %arg5[%c0_4, %c0_5] : memref<1x96xf32, #tpu.memory_space<vmem>>, vector<1x96xf32>
    %7 = vector.broadcast %6 : vector<1x96xf32> to vector<16x96xf32>
    %8 = arith.addf %5, %7 : vector<16x96xf32>
    %9 = arith.truncf %8 : vector<16x96xf32> to vector<16x96xbf16>
    %c0_6 = arith.constant 0 : index
    %c0_7 = arith.constant 0 : index
    %10 = vector.load %arg8[%c0_6, %c0_7] : memref<16x96xbf16, #tpu.memory_space<vmem>>, vector<16x96xbf16>
    tpu.vector_store %arg8[%c0_6, %c0_7], %9 {strides = array<i32>} : memref<16x96xbf16, #tpu.memory_space<vmem>>, vector<16x96xbf16>,
    return
  }
  func.func @transform_0(%arg0: i32, %arg1: i32, %arg2: i32) -> (i32, i32) {
    %c0_i32 = arith.constant 0 : i32
    return %arg0, %arg2 : i32, i32
  }
  func.func @transform_1(%arg0: i32, %arg1: i32, %arg2: i32) -> (i32, i32) {
    %c0_i32 = arith.constant 0 : i32
    return %arg2, %arg1 : i32, i32
  }
  func.func @transform_2(%arg0: i32, %arg1: i32, %arg2: i32) -> (i32, i32) {
    %c0_i32 = arith.constant 0 : i32
    %c0_i32_0 = arith.constant 0 : i32
    return %c0_i32, %arg1 : i32, i32
  }
  func.func @transform_3(%arg0: i32, %arg1: i32, %arg2: i32) -> (i32, i32) {
    %c0_i32 = arith.constant 0 : i32
    %c0_i32_0 = arith.constant 0 : i32
    %c0_i32_1 = arith.constant 0 : i32
    return %c0_i32, %c0_i32_0 : i32, i32
  }
  func.func @transform_4(%arg0: i32, %arg1: i32, %arg2: i32) -> (i32, i32) {
    %c0_i32 = arith.constant 0 : i32
    %c0_i32_0 = arith.constant 0 : i32
    %c0_i32_1 = arith.constant 0 : i32
    return %c0_i32, %c0_i32_0 : i32, i32
  }
  func.func @transform_5(%arg0: i32, %arg1: i32, %arg2: i32) -> (i32, i32) {
    %c0_i32 = arith.constant 0 : i32
    return %arg0, %arg1 : i32, i32
  }
}

module attributes {stable_mosaic.version = 11 : i64} {
  func.func @_attn_kernel(%arg0: i32, %arg1: memref<1x8x96xbf16, #tpu.memory_space<vmem>>, %arg2: memref<1x1x8xf32, #tpu.memory_space<vmem>>, %arg3: memref<1x8x32xbf16, #tpu.memory_space<vmem>>, %arg4: memref<8x32xf32, #tpu.memory_space<vmem>>) attributes {dimension_semantics = [#tpu.dimension_semantics<parallel>], iteration_bounds = array<i64: 2>, scalar_prefetch = 0 : i64, scratch_operands = 1 : i64, tpu.core_type = #tpu.core_type<tc>, window_params = [{transform_indices = @transform_0, window_bounds = array<i64: 1, 8, 96>}, {transform_indices = @transform_1, window_bounds = array<i64: 1, 1, 8>}, {transform_indices = @transform_2, window_bounds = array<i64: 1, 8, 32>}]} {
    %c0 = arith.constant 0 : index
    %c0_0 = arith.constant 0 : index
    %c0_1 = arith.constant 0 : index
    %0 = vector.load %arg1[%c0, %c0_0, %c0_1] : memref<1x8x96xbf16, #tpu.memory_space<vmem>>, vector<1x8x96xbf16>
    %1 = vector.shape_cast %0 : vector<1x8x96xbf16> to vector<8x96xbf16>
    %c0_2 = arith.constant 0 : index
    %c0_3 = arith.constant 0 : index
    %c0_4 = arith.constant 0 : index
    %2 = vector.load %arg2[%c0_2, %c0_3, %c0_4] : memref<1x1x8xf32, #tpu.memory_space<vmem>>, vector<1x1x8xf32>
    %3 = vector.shape_cast %2 : vector<1x1x8xf32> to vector<1x8xf32>
    %cst = arith.constant 5.000000e-01 : f32
    %4 = vector.broadcast %cst : f32 to vector<1x8xf32>
    %5 = arith.cmpf ogt, %3, %4 : vector<1x8xf32>
    %6 = vector.extract_strided_slice %1 {offsets = [0, 0], sizes = [8, 8], strides = [1, 1]} : vector<8x96xbf16> to vector<8x8xbf16>
    %7 = vector.extract_strided_slice %1 {offsets = [0, 8], sizes = [8, 8], strides = [1, 1]} : vector<8x96xbf16> to vector<8x8xbf16>
    %8 = vector.extract_strided_slice %1 {offsets = [0, 16], sizes = [8, 8], strides = [1, 1]} : vector<8x96xbf16> to vector<8x8xbf16>
    %cst_5 = arith.constant dense<0.000000e+00> : vector<8x8xf32>
    %9 = tpu.matmul %6, %7, %cst_5 {dimension_numbers = #tpu.dot_dimension_numbers<[1], [1], [0], [0], [0, 0, 1, 0], [], []>} : vector<8x8xbf16>, vector<8x8xbf16>, vector<8x8xf32> -> vector<8x8xf32>
    %cst_6 = arith.constant -1.000000e+30 : f32
    %10 = vector.shape_cast %5 : vector<1x8xi1> to vector<1x8xi1>
    %11 = vector.broadcast %10 : vector<1x8xi1> to vector<8x8xi1>
    %12 = vector.broadcast %cst_6 : f32 to vector<8x8xf32>
    %13 = arith.select %11, %12, %9 : vector<8x8xi1>, vector<8x8xf32>
    %cst_7 = arith.constant dense<0xFF800000> : vector<8xf32>
    %14 = vector.multi_reduction <maximumf>, %13, %cst_7 [1] : vector<8x8xf32> to vector<8xf32>
    %15 = vector.shape_cast %14 : vector<8xf32> to vector<8x1xf32>
    %16 = vector.broadcast %15 : vector<8x1xf32> to vector<8x8xf32>
    %17 = arith.subf %13, %16 : vector<8x8xf32>
    %18 = math.exp %17 : vector<8x8xf32>
    %cst_8 = arith.constant dense<0.000000e+00> : vector<8xf32>
    %19 = vector.multi_reduction <add>, %18, %cst_8 [1] : vector<8x8xf32> to vector<8xf32>
    %20 = vector.shape_cast %19 : vector<8xf32> to vector<8x1xf32>
    %21 = tpu.reciprocal %20 {approx = true} : vector<8x1xf32> -> vector<8x1xf32>
    %22 = vector.broadcast %21 : vector<8x1xf32> to vector<8x8xf32>
    %23 = arith.mulf %18, %22 : vector<8x8xf32>
    %24 = arith.truncf %23 : vector<8x8xf32> to vector<8x8xbf16>
    %cst_9 = arith.constant dense<0.000000e+00> : vector<8x8xf32>
    %25 = tpu.matmul %24, %8, %cst_9 {dimension_numbers = #tpu.dot_dimension_numbers<[1], [0], [0], [1], [0, 0, 1, 1], [], []>} : vector<8x8xbf16>, vector<8x8xbf16>, vector<8x8xf32> -> vector<8x8xf32>
    %c0_10 = arith.constant 0 : index
    %c0_11 = arith.constant 0 : index
    %26 = vector.load %arg4[%c0_10, %c0_11] : memref<8x32xf32, #tpu.memory_space<vmem>>, vector<8x8xf32>
    tpu.vector_store %arg4[%c0_10, %c0_11], %25 {strides = array<i32>} : memref<8x32xf32, #tpu.memory_space<vmem>>, vector<8x8xf32>,
    %27 = vector.extract_strided_slice %1 {offsets = [0, 24], sizes = [8, 8], strides = [1, 1]} : vector<8x96xbf16> to vector<8x8xbf16>
    %28 = vector.extract_strided_slice %1 {offsets = [0, 32], sizes = [8, 8], strides = [1, 1]} : vector<8x96xbf16> to vector<8x8xbf16>
    %29 = vector.extract_strided_slice %1 {offsets = [0, 40], sizes = [8, 8], strides = [1, 1]} : vector<8x96xbf16> to vector<8x8xbf16>
    %cst_12 = arith.constant dense<0.000000e+00> : vector<8x8xf32>
    %30 = tpu.matmul %27, %28, %cst_12 {dimension_numbers = #tpu.dot_dimension_numbers<[1], [1], [0], [0], [0, 0, 1, 0], [], []>} : vector<8x8xbf16>, vector<8x8xbf16>, vector<8x8xf32> -> vector<8x8xf32>
    %cst_13 = arith.constant -1.000000e+30 : f32
    %31 = vector.shape_cast %5 : vector<1x8xi1> to vector<1x8xi1>
    %32 = vector.broadcast %31 : vector<1x8xi1> to vector<8x8xi1>
    %33 = vector.broadcast %cst_13 : f32 to vector<8x8xf32>
    %34 = arith.select %32, %33, %30 : vector<8x8xi1>, vector<8x8xf32>
    %cst_14 = arith.constant dense<0xFF800000> : vector<8xf32>
    %35 = vector.multi_reduction <maximumf>, %34, %cst_14 [1] : vector<8x8xf32> to vector<8xf32>
    %36 = vector.shape_cast %35 : vector<8xf32> to vector<8x1xf32>
    %37 = vector.broadcast %36 : vector<8x1xf32> to vector<8x8xf32>
    %38 = arith.subf %34, %37 : vector<8x8xf32>
    %39 = math.exp %38 : vector<8x8xf32>
    %cst_15 = arith.constant dense<0.000000e+00> : vector<8xf32>
    %40 = vector.multi_reduction <add>, %39, %cst_15 [1] : vector<8x8xf32> to vector<8xf32>
    %41 = vector.shape_cast %40 : vector<8xf32> to vector<8x1xf32>
    %42 = tpu.reciprocal %41 {approx = true} : vector<8x1xf32> -> vector<8x1xf32>
    %43 = vector.broadcast %42 : vector<8x1xf32> to vector<8x8xf32>
    %44 = arith.mulf %39, %43 : vector<8x8xf32>
    %45 = arith.truncf %44 : vector<8x8xf32> to vector<8x8xbf16>
    %cst_16 = arith.constant dense<0.000000e+00> : vector<8x8xf32>
    %46 = tpu.matmul %45, %29, %cst_16 {dimension_numbers = #tpu.dot_dimension_numbers<[1], [0], [0], [1], [0, 0, 1, 1], [], []>} : vector<8x8xbf16>, vector<8x8xbf16>, vector<8x8xf32> -> vector<8x8xf32>
    %c0_17 = arith.constant 0 : index
    %c8 = arith.constant 8 : index
    %47 = vector.load %arg4[%c0_17, %c8] : memref<8x32xf32, #tpu.memory_space<vmem>>, vector<8x8xf32>
    tpu.vector_store %arg4[%c0_17, %c8], %46 {strides = array<i32>} : memref<8x32xf32, #tpu.memory_space<vmem>>, vector<8x8xf32>,
    %48 = vector.extract_strided_slice %1 {offsets = [0, 48], sizes = [8, 8], strides = [1, 1]} : vector<8x96xbf16> to vector<8x8xbf16>
    %49 = vector.extract_strided_slice %1 {offsets = [0, 56], sizes = [8, 8], strides = [1, 1]} : vector<8x96xbf16> to vector<8x8xbf16>
    %50 = vector.extract_strided_slice %1 {offsets = [0, 64], sizes = [8, 8], strides = [1, 1]} : vector<8x96xbf16> to vector<8x8xbf16>
    %cst_18 = arith.constant dense<0.000000e+00> : vector<8x8xf32>
    %51 = tpu.matmul %48, %49, %cst_18 {dimension_numbers = #tpu.dot_dimension_numbers<[1], [1], [0], [0], [0, 0, 1, 0], [], []>} : vector<8x8xbf16>, vector<8x8xbf16>, vector<8x8xf32> -> vector<8x8xf32>
    %cst_19 = arith.constant -1.000000e+30 : f32
    %52 = vector.shape_cast %5 : vector<1x8xi1> to vector<1x8xi1>
    %53 = vector.broadcast %52 : vector<1x8xi1> to vector<8x8xi1>
    %54 = vector.broadcast %cst_19 : f32 to vector<8x8xf32>
    %55 = arith.select %53, %54, %51 : vector<8x8xi1>, vector<8x8xf32>
    %cst_20 = arith.constant dense<0xFF800000> : vector<8xf32>
    %56 = vector.multi_reduction <maximumf>, %55, %cst_20 [1] : vector<8x8xf32> to vector<8xf32>
    %57 = vector.shape_cast %56 : vector<8xf32> to vector<8x1xf32>
    %58 = vector.broadcast %57 : vector<8x1xf32> to vector<8x8xf32>
    %59 = arith.subf %55, %58 : vector<8x8xf32>
    %60 = math.exp %59 : vector<8x8xf32>
    %cst_21 = arith.constant dense<0.000000e+00> : vector<8xf32>
    %61 = vector.multi_reduction <add>, %60, %cst_21 [1] : vector<8x8xf32> to vector<8xf32>
    %62 = vector.shape_cast %61 : vector<8xf32> to vector<8x1xf32>
    %63 = tpu.reciprocal %62 {approx = true} : vector<8x1xf32> -> vector<8x1xf32>
    %64 = vector.broadcast %63 : vector<8x1xf32> to vector<8x8xf32>
    %65 = arith.mulf %60, %64 : vector<8x8xf32>
    %66 = arith.truncf %65 : vector<8x8xf32> to vector<8x8xbf16>
    %cst_22 = arith.constant dense<0.000000e+00> : vector<8x8xf32>
    %67 = tpu.matmul %66, %50, %cst_22 {dimension_numbers = #tpu.dot_dimension_numbers<[1], [0], [0], [1], [0, 0, 1, 1], [], []>} : vector<8x8xbf16>, vector<8x8xbf16>, vector<8x8xf32> -> vector<8x8xf32>
    %c0_23 = arith.constant 0 : index
    %c16 = arith.constant 16 : index
    %68 = vector.load %arg4[%c0_23, %c16] : memref<8x32xf32, #tpu.memory_space<vmem>>, vector<8x8xf32>
    tpu.vector_store %arg4[%c0_23, %c16], %67 {strides = array<i32>} : memref<8x32xf32, #tpu.memory_space<vmem>>, vector<8x8xf32>,
    %69 = vector.extract_strided_slice %1 {offsets = [0, 72], sizes = [8, 8], strides = [1, 1]} : vector<8x96xbf16> to vector<8x8xbf16>
    %70 = vector.extract_strided_slice %1 {offsets = [0, 80], sizes = [8, 8], strides = [1, 1]} : vector<8x96xbf16> to vector<8x8xbf16>
    %71 = vector.extract_strided_slice %1 {offsets = [0, 88], sizes = [8, 8], strides = [1, 1]} : vector<8x96xbf16> to vector<8x8xbf16>
    %cst_24 = arith.constant dense<0.000000e+00> : vector<8x8xf32>
    %72 = tpu.matmul %69, %70, %cst_24 {dimension_numbers = #tpu.dot_dimension_numbers<[1], [1], [0], [0], [0, 0, 1, 0], [], []>} : vector<8x8xbf16>, vector<8x8xbf16>, vector<8x8xf32> -> vector<8x8xf32>
    %cst_25 = arith.constant -1.000000e+30 : f32
    %73 = vector.shape_cast %5 : vector<1x8xi1> to vector<1x8xi1>
    %74 = vector.broadcast %73 : vector<1x8xi1> to vector<8x8xi1>
    %75 = vector.broadcast %cst_25 : f32 to vector<8x8xf32>
    %76 = arith.select %74, %75, %72 : vector<8x8xi1>, vector<8x8xf32>
    %cst_26 = arith.constant dense<0xFF800000> : vector<8xf32>
    %77 = vector.multi_reduction <maximumf>, %76, %cst_26 [1] : vector<8x8xf32> to vector<8xf32>
    %78 = vector.shape_cast %77 : vector<8xf32> to vector<8x1xf32>
    %79 = vector.broadcast %78 : vector<8x1xf32> to vector<8x8xf32>
    %80 = arith.subf %76, %79 : vector<8x8xf32>
    %81 = math.exp %80 : vector<8x8xf32>
    %cst_27 = arith.constant dense<0.000000e+00> : vector<8xf32>
    %82 = vector.multi_reduction <add>, %81, %cst_27 [1] : vector<8x8xf32> to vector<8xf32>
    %83 = vector.shape_cast %82 : vector<8xf32> to vector<8x1xf32>
    %84 = tpu.reciprocal %83 {approx = true} : vector<8x1xf32> -> vector<8x1xf32>
    %85 = vector.broadcast %84 : vector<8x1xf32> to vector<8x8xf32>
    %86 = arith.mulf %81, %85 : vector<8x8xf32>
    %87 = arith.truncf %86 : vector<8x8xf32> to vector<8x8xbf16>
    %cst_28 = arith.constant dense<0.000000e+00> : vector<8x8xf32>
    %88 = tpu.matmul %87, %71, %cst_28 {dimension_numbers = #tpu.dot_dimension_numbers<[1], [0], [0], [1], [0, 0, 1, 1], [], []>} : vector<8x8xbf16>, vector<8x8xbf16>, vector<8x8xf32> -> vector<8x8xf32>
    %c0_29 = arith.constant 0 : index
    %c24 = arith.constant 24 : index
    %89 = vector.load %arg4[%c0_29, %c24] : memref<8x32xf32, #tpu.memory_space<vmem>>, vector<8x8xf32>
    tpu.vector_store %arg4[%c0_29, %c24], %88 {strides = array<i32>} : memref<8x32xf32, #tpu.memory_space<vmem>>, vector<8x8xf32>,
    %c0_30 = arith.constant 0 : index
    %c0_31 = arith.constant 0 : index
    %90 = vector.load %arg4[%c0_30, %c0_31] : memref<8x32xf32, #tpu.memory_space<vmem>>, vector<8x32xf32>
    %91 = arith.truncf %90 : vector<8x32xf32> to vector<8x32xbf16>
    %c0_32 = arith.constant 0 : index
    %c0_33 = arith.constant 0 : index
    %c0_34 = arith.constant 0 : index
    %92 = vector.load %arg3[%c0_32, %c0_33, %c0_34] : memref<1x8x32xbf16, #tpu.memory_space<vmem>>, vector<1x8x32xbf16>
    %93 = vector.shape_cast %92 : vector<1x8x32xbf16> to vector<8x32xbf16>
    %94 = vector.shape_cast %91 : vector<8x32xbf16> to vector<1x8x32xbf16>
    tpu.vector_store %arg3[%c0_32, %c0_33, %c0_34], %94 {strides = array<i32>} : memref<1x8x32xbf16, #tpu.memory_space<vmem>>, vector<1x8x32xbf16>,
    return
  }
  func.func @transform_0(%arg0: i32) -> (i32, i32, i32) {
    %c0_i32 = arith.constant 0 : i32
    %c0_i32_0 = arith.constant 0 : i32
    %c0_i32_1 = arith.constant 0 : i32
    return %arg0, %c0_i32, %c0_i32_0 : i32, i32, i32
  }
  func.func @transform_1(%arg0: i32) -> (i32, i32, i32) {
    %c0_i32 = arith.constant 0 : i32
    %c0_i32_0 = arith.constant 0 : i32
    %c0_i32_1 = arith.constant 0 : i32
    return %arg0, %c0_i32, %c0_i32_0 : i32, i32, i32
  }
  func.func @transform_2(%arg0: i32) -> (i32, i32, i32) {
    %c0_i32 = arith.constant 0 : i32
    %c0_i32_0 = arith.constant 0 : i32
    %c0_i32_1 = arith.constant 0 : i32
    return %arg0, %c0_i32, %c0_i32_0 : i32, i32, i32
  }
}

module attributes {stable_mosaic.version = 11 : i64} {
  func.func @_fused_matmul_kernel(%arg0: i32, %arg1: i32, %arg2: i32, %arg3: memref<16x32xbf16, #tpu.memory_space<vmem>>, %arg4: memref<32x32xbf16, #tpu.memory_space<vmem>>, %arg5: memref<1x32xf32, #tpu.memory_space<vmem>>, %arg6: memref<16x32xbf16, #tpu.memory_space<vmem>>, %arg7: memref<16x32xbf16, #tpu.memory_space<vmem>>) attributes {dimension_semantics = [#tpu.dimension_semantics<parallel>, #tpu.dimension_semantics<parallel>, #tpu.dimension_semantics<arbitrary>], iteration_bounds = array<i64: 1, 1, 1>, scalar_prefetch = 0 : i64, scratch_operands = 0 : i64, tpu.core_type = #tpu.core_type<tc>, window_params = [{transform_indices = @transform_0, window_bounds = array<i64: 16, 32>}, {transform_indices = @transform_1, window_bounds = array<i64: 32, 32>}, {transform_indices = @transform_2, window_bounds = array<i64: 1, 32>}, {transform_indices = @transform_3, window_bounds = array<i64: 16, 32>}, {transform_indices = @transform_4, window_bounds = array<i64: 16, 32>}]} {
    %c0 = arith.constant 0 : index
    %c0_0 = arith.constant 0 : index
    %0 = vector.load %arg3[%c0, %c0_0] : memref<16x32xbf16, #tpu.memory_space<vmem>>, vector<16x32xbf16>
    %c0_1 = arith.constant 0 : index
    %c0_2 = arith.constant 0 : index
    %1 = vector.load %arg4[%c0_1, %c0_2] : memref<32x32xbf16, #tpu.memory_space<vmem>>, vector<32x32xbf16>
    %cst = arith.constant dense<0.000000e+00> : vector<16x32xf32>
    %2 = tpu.matmul %0, %1, %cst {dimension_numbers = #tpu.dot_dimension_numbers<[1], [0], [0], [1], [0, 0, 1, 1], [], []>} : vector<16x32xbf16>, vector<32x32xbf16>, vector<16x32xf32> -> vector<16x32xf32>
    %c0_3 = arith.constant 0 : index
    %c0_4 = arith.constant 0 : index
    %3 = vector.load %arg5[%c0_3, %c0_4] : memref<1x32xf32, #tpu.memory_space<vmem>>, vector<1x32xf32>
    %4 = vector.broadcast %3 : vector<1x32xf32> to vector<16x32xf32>
    %5 = arith.addf %2, %4 : vector<16x32xf32>
    %c0_5 = arith.constant 0 : index
    %c0_6 = arith.constant 0 : index
    %6 = vector.load %arg6[%c0_5, %c0_6] : memref<16x32xbf16, #tpu.memory_space<vmem>>, vector<16x32xbf16>
    %7 = arith.extf %6 : vector<16x32xbf16> to vector<16x32xf32>
    %8 = arith.addf %5, %7 : vector<16x32xf32>
    %9 = arith.truncf %8 : vector<16x32xf32> to vector<16x32xbf16>
    %c0_7 = arith.constant 0 : index
    %c0_8 = arith.constant 0 : index
    %10 = vector.load %arg7[%c0_7, %c0_8] : memref<16x32xbf16, #tpu.memory_space<vmem>>, vector<16x32xbf16>
    tpu.vector_store %arg7[%c0_7, %c0_8], %9 {strides = array<i32>} : memref<16x32xbf16, #tpu.memory_space<vmem>>, vector<16x32xbf16>,
    return
  }
  func.func @transform_0(%arg0: i32, %arg1: i32, %arg2: i32) -> (i32, i32) {
    %c0_i32 = arith.constant 0 : i32
    return %arg0, %arg2 : i32, i32
  }
  func.func @transform_1(%arg0: i32, %arg1: i32, %arg2: i32) -> (i32, i32) {
    %c0_i32 = arith.constant 0 : i32
    return %arg2, %arg1 : i32, i32
  }
  func.func @transform_2(%arg0: i32, %arg1: i32, %arg2: i32) -> (i32, i32) {
    %c0_i32 = arith.constant 0 : i32
    %c0_i32_0 = arith.constant 0 : i32
    return %c0_i32, %arg1 : i32, i32
  }
  func.func @transform_3(%arg0: i32, %arg1: i32, %arg2: i32) -> (i32, i32) {
    %c0_i32 = arith.constant 0 : i32
    return %arg0, %arg1 : i32, i32
  }
  func.func @transform_4(%arg0: i32, %arg1: i32, %arg2: i32) -> (i32, i32) {
    %c0_i32 = arith.constant 0 : i32
    return %arg0, %arg1 : i32, i32
  }
}

module attributes {stable_mosaic.version = 11 : i64} {
  func.func @_fused_matmul_kernel(%arg0: i32, %arg1: i32, %arg2: i32, %arg3: memref<16x32xbf16, #tpu.memory_space<vmem>>, %arg4: memref<32x64xbf16, #tpu.memory_space<vmem>>, %arg5: memref<1x64xf32, #tpu.memory_space<vmem>>, %arg6: memref<1x32xf32, #tpu.memory_space<vmem>>, %arg7: memref<1x32xf32, #tpu.memory_space<vmem>>, %arg8: memref<16x64xbf16, #tpu.memory_space<vmem>>, %arg9: memref<16x32xbf16, #tpu.memory_space<vmem>>) attributes {dimension_semantics = [#tpu.dimension_semantics<parallel>, #tpu.dimension_semantics<arbitrary>, #tpu.dimension_semantics<arbitrary>], iteration_bounds = array<i64: 1, 1, 1>, scalar_prefetch = 0 : i64, scratch_operands = 1 : i64, tpu.core_type = #tpu.core_type<tc>, window_params = [{transform_indices = @transform_0, window_bounds = array<i64: 16, 32>}, {transform_indices = @transform_1, window_bounds = array<i64: 32, 64>}, {transform_indices = @transform_2, window_bounds = array<i64: 1, 64>}, {pipeline_mode = #tpu.pipeline_mode<synchronous>, transform_indices = @transform_3, window_bounds = array<i64: 1, 32>}, {pipeline_mode = #tpu.pipeline_mode<synchronous>, transform_indices = @transform_4, window_bounds = array<i64: 1, 32>}, {transform_indices = @transform_5, window_bounds = array<i64: 16, 64>}]} {
    %c0_i32 = arith.constant 0 : i32
    %0 = arith.cmpi eq, %arg1, %c0_i32 : i32
    %1 = arith.extui %0 : i1 to i32
    %c0_i32_0 = arith.constant 0 : i32
    %2 = arith.cmpi ne, %1, %c0_i32_0 : i32
    scf.if %2 {
      %c0_9 = arith.constant 0 : index
      %c0_10 = arith.constant 0 : index
      %13 = vector.load %arg3[%c0_9, %c0_10] : memref<16x32xbf16, #tpu.memory_space<vmem>>, vector<16x32xbf16>
      %14 = arith.extf %13 : vector<16x32xbf16> to vector<16x32xf32>
      %cst_11 = arith.constant dense<0.000000e+00> : vector<16xf32>
      %15 = vector.multi_reduction <add>, %14, %cst_11 [1] : vector<16x32xf32> to vector<16xf32>
      %16 = vector.shape_cast %15 : vector<16xf32> to vector<16x1xf32>
      %cst_12 = arith.constant 3.200000e+01 : f32
      %17 = vector.broadcast %cst_12 : f32 to vector<16x1xf32>
      %18 = arith.divf %16, %17 : vector<16x1xf32>
      %19 = vector.broadcast %18 : vector<16x1xf32> to vector<16x32xf32>
      %20 = arith.subf %14, %19 : vector<16x32xf32>
      %21 = arith.mulf %20, %20 : vector<16x32xf32>
      %cst_13 = arith.constant dense<0.000000e+00> : vector<16xf32>
      %22 = vector.multi_reduction <add>, %21, %cst_13 [1] : vector<16x32xf32> to vector<16xf32>
      %23 = vector.shape_cast %22 : vector<16xf32> to vector<16x1xf32>
      %cst_14 = arith.constant 3.200000e+01 : f32
      %24 = vector.broadcast %cst_14 : f32 to vector<16x1xf32>
      %25 = arith.divf %23, %24 : vector<16x1xf32>
      %cst_15 = arith.constant 9.99999974E-6 : f32
      %26 = vector.broadcast %cst_15 : f32 to vector<16x1xf32>
      %27 = arith.addf %25, %26 : vector<16x1xf32>
      %28 = math.rsqrt %27 : vector<16x1xf32>
      %29 = vector.broadcast %28 : vector<16x1xf32> to vector<16x32xf32>
      %30 = arith.mulf %20, %29 : vector<16x32xf32>
      %c0_16 = arith.constant 0 : index
      %c0_17 = arith.constant 0 : index
      %31 = vector.load %arg6[%c0_16, %c0_17] : memref<1x32xf32, #tpu.memory_space<vmem>>, vector<1x32xf32>
      %32 = vector.broadcast %31 : vector<1x32xf32> to vector<16x32xf32>
      %33 = arith.mulf %30, %32 : vector<16x32xf32>
      %c0_18 = arith.constant 0 : index
      %c0_19 = arith.constant 0 : index
      %34 = vector.load %arg7[%c0_18, %c0_19] : memref<1x32xf32, #tpu.memory_space<vmem>>, vector<1x32xf32>
      %35 = vector.broadcast %34 : vector<1x32xf32> to vector<16x32xf32>
      %36 = arith.addf %33, %35 : vector<16x32xf32>
      %37 = arith.truncf %36 : vector<16x32xf32> to vector<16x32xbf16>
      %c0_20 = arith.constant 0 : index
      %c0_21 = arith.constant 0 : index
      %38 = vector.load %arg9[%c0_20, %c0_21] : memref<16x32xbf16, #tpu.memory_space<vmem>>, vector<16x32xbf16>
      tpu.vector_store %arg9[%c0_20, %c0_21], %37 {strides = array<i32>} : memref<16x32xbf16, #tpu.memory_space<vmem>>, vector<16x32xbf16>,
    } else {
    }
    %c0 = arith.constant 0 : index
    %c0_1 = arith.constant 0 : index
    %3 = vector.load %arg9[%c0, %c0_1] : memref<16x32xbf16, #tpu.memory_space<vmem>>, vector<16x32xbf16>
    %c0_2 = arith.constant 0 : index
    %c0_3 = arith.constant 0 : index
    %4 = vector.load %arg4[%c0_2, %c0_3] : memref<32x64xbf16, #tpu.memory_space<vmem>>, vector<32x64xbf16>
    %cst = arith.constant dense<0.000000e+00> : vector<16x64xf32>
    %5 = tpu.matmul %3, %4, %cst {dimension_numbers = #tpu.dot_dimension_numbers<[1], [0], [0], [1], [0, 0, 1, 1], [], []>} : vector<16x32xbf16>, vector<32x64xbf16>, vector<16x64xf32> -> vector<16x64xf32>
    %c0_4 = arith.constant 0 : index
    %c0_5 = arith.constant 0 : index
    %6 = vector.load %arg5[%c0_4, %c0_5] : memref<1x64xf32, #tpu.memory_space<vmem>>, vector<1x64xf32>
    %7 = vector.broadcast %6 : vector<1x64xf32> to vector<16x64xf32>
    %8 = arith.addf %5, %7 : vector<16x64xf32>
    %cst_6 = arith.constant 0.000000e+00 : f32
    %9 = vector.broadcast %cst_6 : f32 to vector<16x64xf32>
    %10 = arith.maximumf %8, %9 : vector<16x64xf32>
    %11 = arith.truncf %10 : vector<16x64xf32> to vector<16x64xbf16>
    %c0_7 = arith.constant 0 : index
    %c0_8 = arith.constant 0 : index
    %12 = vector.load %arg8[%c0_7, %c0_8] : memref<16x64xbf16, #tpu.memory_space<vmem>>, vector<16x64xbf16>
    tpu.vector_store %arg8[%c0_7, %c0_8], %11 {strides = array<i32>} : memref<16x64xbf16, #tpu.memory_space<vmem>>, vector<16x64xbf16>,
    return
  }
  func.func @transform_0(%arg0: i32, %arg1: i32, %arg2: i32) -> (i32, i32) {
    %c0_i32 = arith.constant 0 : i32
    return %arg0, %arg2 : i32, i32
  }
  func.func @transform_1(%arg0: i32, %arg1: i32, %arg2: i32) -> (i32, i32) {
    %c0_i32 = arith.constant 0 : i32
    return %arg2, %arg1 : i32, i32
  }
  func.func @transform_2(%arg0: i32, %arg1: i32, %arg2: i32) -> (i32, i32) {
    %c0_i32 = arith.constant 0 : i32
    %c0_i32_0 = arith.constant 0 : i32
    return %c0_i32, %arg1 : i32, i32
  }
  func.func @transform_3(%arg0: i32, %arg1: i32, %arg2: i32) -> (i32, i32) {
    %c0_i32 = arith.constant 0 : i32
    %c0_i32_0 = arith.constant 0 : i32
    %c0_i32_1 = arith.constant 0 : i32
    return %c0_i32, %c0_i32_0 : i32, i32
  }
  func.func @transform_4(%arg0: i32, %arg1: i32, %arg2: i32) -> (i32, i32) {
    %c0_i32 = arith.constant 0 : i32
    %c0_i32_0 = arith.constant 0 : i32
    %c0_i32_1 = arith.constant 0 : i32
    return %c0_i32, %c0_i32_0 : i32, i32
  }
  func.func @transform_5(%arg0: i32, %arg1: i32, %arg2: i32) -> (i32, i32) {
    %c0_i32 = arith.constant 0 : i32
    return %arg0, %arg1 : i32, i32
  }
}

module attributes {stable_mosaic.version = 11 : i64} {
  func.func @_fused_matmul_kernel(%arg0: i32, %arg1: i32, %arg2: i32, %arg3: memref<16x64xbf16, #tpu.memory_space<vmem>>, %arg4: memref<64x32xbf16, #tpu.memory_space<vmem>>, %arg5: memref<1x32xf32, #tpu.memory_space<vmem>>, %arg6: memref<16x32xbf16, #tpu.memory_space<vmem>>, %arg7: memref<16x32xbf16, #tpu.memory_space<vmem>>) attributes {dimension_semantics = [#tpu.dimension_semantics<parallel>, #tpu.dimension_semantics<parallel>, #tpu.dimension_semantics<arbitrary>], iteration_bounds = array<i64: 1, 1, 1>, scalar_prefetch = 0 : i64, scratch_operands = 0 : i64, tpu.core_type = #tpu.core_type<tc>, window_params = [{transform_indices = @transform_0, window_bounds = array<i64: 16, 64>}, {transform_indices = @transform_1, window_bounds = array<i64: 64, 32>}, {transform_indices = @transform_2, window_bounds = array<i64: 1, 32>}, {transform_indices = @transform_3, window_bounds = array<i64: 16, 32>}, {transform_indices = @transform_4, window_bounds = array<i64: 16, 32>}]} {
    %c0 = arith.constant 0 : index
    %c0_0 = arith.constant 0 : index
    %0 = vector.load %arg3[%c0, %c0_0] : memref<16x64xbf16, #tpu.memory_space<vmem>>, vector<16x64xbf16>
    %c0_1 = arith.constant 0 : index
    %c0_2 = arith.constant 0 : index
    %1 = vector.load %arg4[%c0_1, %c0_2] : memref<64x32xbf16, #tpu.memory_space<vmem>>, vector<64x32xbf16>
    %cst = arith.constant dense<0.000000e+00> : vector<16x32xf32>
    %2 = tpu.matmul %0, %1, %cst {dimension_numbers = #tpu.dot_dimension_numbers<[1], [0], [0], [1], [0, 0, 1, 1], [], []>} : vector<16x64xbf16>, vector<64x32xbf16>, vector<16x32xf32> -> vector<16x32xf32>
    %c0_3 = arith.constant 0 : index
    %c0_4 = arith.constant 0 : index
    %3 = vector.load %arg5[%c0_3, %c0_4] : memref<1x32xf32, #tpu.memory_space<vmem>>, vector<1x32xf32>
    %4 = vector.broadcast %3 : vector<1x32xf32> to vector<16x32xf32>
    %5 = arith.addf %2, %4 : vector<16x32xf32>
    %c0_5 = arith.constant 0 : index
    %c0_6 = arith.constant 0 : index
    %6 = vector.load %arg6[%c0_5, %c0_6] : memref<16x32xbf16, #tpu.memory_space<vmem>>, vector<16x32xbf16>
    %7 = arith.extf %6 : vector<16x32xbf16> to vector<16x32xf32>
    %8 = arith.addf %5, %7 : vector<16x32xf32>
    %9 = arith.truncf %8 : vector<16x32xf32> to vector<16x32xbf16>
    %c0_7 = arith.constant 0 : index
    %c0_8 = arith.constant 0 : index
    %10 = vector.load %arg7[%c0_7, %c0_8] : memref<16x32xbf16, #tpu.memory_space<vmem>>, vector<16x32xbf16>
    tpu.vector_store %arg7[%c0_7, %c0_8], %9 {strides = array<i32>} : memref<16x32xbf16, #tpu.memory_space<vmem>>, vector<16x32xbf16>,
    return
  }
  func.func @transform_0(%arg0: i32, %arg1: i32, %arg2: i32) -> (i32, i32) {
    %c0_i32 = arith.constant 0 : i32
    return %arg0, %arg2 : i32, i32
  }
  func.func @transform_1(%arg0: i32, %arg1: i32, %arg2: i32) -> (i32, i32) {
    %c0_i32 = arith.constant 0 : i32
    return %arg2, %arg1 : i32, i32
  }
  func.func @transform_2(%arg0: i32, %arg1: i32, %arg2: i32) -> (i32, i32) {
    %c0_i32 = arith.constant 0 : i32
    %c0_i32_0 = arith.constant 0 : i32
    return %c0_i32, %arg1 : i32, i32
  }
  func.func @transform_3(%arg0: i32, %arg1: i32, %arg2: i32) -> (i32, i32) {
    %c0_i32 = arith.constant 0 : i32
    return %arg0, %arg1 : i32, i32
  }
  func.func @transform_4(%arg0: i32, %arg1: i32, %arg2: i32) -> (i32, i32) {
    %c0_i32 = arith.constant 0 : i32
    return %arg0, %arg1 : i32, i32
  }
}

module attributes {stable_mosaic.version = 11 : i64} {
  func.func @_fused_matmul_kernel(%arg0: i32, %arg1: i32, %arg2: i32, %arg3: memref<16x64xbf16, #tpu.memory_space<vmem>>, %arg4: memref<64x32xbf16, #tpu.memory_space<vmem>>, %arg5: memref<1x32xf32, #tpu.memory_space<vmem>>, %arg6: memref<16x32xbf16, #tpu.memory_space<vmem>>, %arg7: memref<1x32xf32, #tpu.memory_space<vmem>>, %arg8: memref<1x32xf32, #tpu.memory_space<vmem>>, %arg9: memref<16x32xf32, #tpu.memory_space<vmem>>) attributes {dimension_semantics = [#tpu.dimension_semantics<parallel>, #tpu.dimension_semantics<parallel>, #tpu.dimension_semantics<arbitrary>], iteration_bounds = array<i64: 1, 1, 1>, scalar_prefetch = 0 : i64, scratch_operands = 0 : i64, tpu.core_type = #tpu.core_type<tc>, window_params = [{transform_indices = @transform_0, window_bounds = array<i64: 16, 64>}, {transform_indices = @transform_1, window_bounds = array<i64: 64, 32>}, {transform_indices = @transform_2, window_bounds = array<i64: 1, 32>}, {transform_indices = @transform_3, window_bounds = array<i64: 16, 32>}, {pipeline_mode = #tpu.pipeline_mode<synchronous>, transform_indices = @transform_4, window_bounds = array<i64: 1, 32>}, {pipeline_mode = #tpu.pipeline_mode<synchronous>, transform_indices = @transform_5, window_bounds = array<i64: 1, 32>}, {transform_indices = @transform_6, window_bounds = array<i64: 16, 32>}]} {
    %c0 = arith.constant 0 : index
    %c0_0 = arith.constant 0 : index
    %0 = vector.load %arg3[%c0, %c0_0] : memref<16x64xbf16, #tpu.memory_space<vmem>>, vector<16x64xbf16>
    %c0_1 = arith.constant 0 : index
    %c0_2 = arith.constant 0 : index
    %1 = vector.load %arg4[%c0_1, %c0_2] : memref<64x32xbf16, #tpu.memory_space<vmem>>, vector<64x32xbf16>
    %cst = arith.constant dense<0.000000e+00> : vector<16x32xf32>
    %2 = tpu.matmul %0, %1, %cst {dimension_numbers = #tpu.dot_dimension_numbers<[1], [0], [0], [1], [0, 0, 1, 1], [], []>} : vector<16x64xbf16>, vector<64x32xbf16>, vector<16x32xf32> -> vector<16x32xf32>
    %c0_3 = arith.constant 0 : index
    %c0_4 = arith.constant 0 : index
    %3 = vector.load %arg5[%c0_3, %c0_4] : memref<1x32xf32, #tpu.memory_space<vmem>>, vector<1x32xf32>
    %4 = vector.broadcast %3 : vector<1x32xf32> to vector<16x32xf32>
    %5 = arith.addf %2, %4 : vector<16x32xf32>
    %c0_5 = arith.constant 0 : index
    %c0_6 = arith.constant 0 : index
    %6 = vector.load %arg6[%c0_5, %c0_6] : memref<16x32xbf16, #tpu.memory_space<vmem>>, vector<16x32xbf16>
    %7 = arith.extf %6 : vector<16x32xbf16> to vector<16x32xf32>
    %8 = arith.addf %5, %7 : vector<16x32xf32>
    %cst_7 = arith.constant dense<0.000000e+00> : vector<16xf32>
    %9 = vector.multi_reduction <add>, %8, %cst_7 [1] : vector<16x32xf32> to vector<16xf32>
    %10 = vector.shape_cast %9 : vector<16xf32> to vector<16x1xf32>
    %cst_8 = arith.constant 3.200000e+01 : f32
    %11 = vector.broadcast %cst_8 : f32 to vector<16x1xf32>
    %12 = arith.divf %10, %11 : vector<16x1xf32>
    %13 = vector.broadcast %12 : vector<16x1xf32> to vector<16x32xf32>
    %14 = arith.subf %8, %13 : vector<16x32xf32>
    %15 = arith.mulf %14, %14 : vector<16x32xf32>
    %cst_9 = arith.constant dense<0.000000e+00> : vector<16xf32>
    %16 = vector.multi_reduction <add>, %15, %cst_9 [1] : vector<16x32xf32> to vector<16xf32>
    %17 = vector.shape_cast %16 : vector<16xf32> to vector<16x1xf32>
    %cst_10 = arith.constant 3.200000e+01 : f32
    %18 = vector.broadcast %cst_10 : f32 to vector<16x1xf32>
    %19 = arith.divf %17, %18 : vector<16x1xf32>
    %cst_11 = arith.constant 9.99999974E-6 : f32
    %20 = vector.broadcast %cst_11 : f32 to vector<16x1xf32>
    %21 = arith.addf %19, %20 : vector<16x1xf32>
    %22 = math.rsqrt %21 : vector<16x1xf32>
    %23 = vector.broadcast %22 : vector<16x1xf32> to vector<16x32xf32>
    %24 = arith.mulf %14, %23 : vector<16x32xf32>
    %c0_12 = arith.constant 0 : index
    %c0_13 = arith.constant 0 : index
    %25 = vector.load %arg7[%c0_12, %c0_13] : memref<1x32xf32, #tpu.memory_space<vmem>>, vector<1x32xf32>
    %26 = vector.broadcast %25 : vector<1x32xf32> to vector<16x32xf32>
    %27 = arith.mulf %24, %26 : vector<16x32xf32>
    %c0_14 = arith.constant 0 : index
    %c0_15 = arith.constant 0 : index
    %28 = vector.load %arg8[%c0_14, %c0_15] : memref<1x32xf32, #tpu.memory_space<vmem>>, vector<1x32xf32>
    %29 = vector.broadcast %28 : vector<1x32xf32> to vector<16x32xf32>
    %30 = arith.addf %27, %29 : vector<16x32xf32>
    %c0_16 = arith.constant 0 : index
    %c0_17 = arith.constant 0 : index
    %31 = vector.load %arg9[%c0_16, %c0_17] : memref<16x32xf32, #tpu.memory_space<vmem>>, vector<16x32xf32>
    tpu.vector_store %arg9[%c0_16, %c0_17], %30 {strides = array<i32>} : memref<16x32xf32, #tpu.memory_space<vmem>>, vector<16x32xf32>,
    return
  }
  func.func @transform_0(%arg0: i32, %arg1: i32, %arg2: i32) -> (i32, i32) {
    %c0_i32 = arith.constant 0 : i32
    return %arg0, %arg2 : i32, i32
  }
  func.func @transform_1(%arg0: i32, %arg1: i32, %arg2: i32) -> (i32, i32) {
    %c0_i32 = arith.constant 0 : i32
    return %arg2, %arg1 : i32, i32
  }
  func.func @transform_2(%arg0: i32, %arg1: i32, %arg2: i32) -> (i32, i32) {
    %c0_i32 = arith.constant 0 : i32
    %c0_i32_0 = arith.constant 0 : i32
    return %c0_i32, %arg1 : i32, i32
  }
  func.func @transform_3(%arg0: i32, %arg1: i32, %arg2: i32) -> (i32, i32) {
    %c0_i32 = arith.constant 0 : i32
    return %arg0, %arg1 : i32, i32
  }
  func.func @transform_4(%arg0: i32, %arg1: i32, %arg2: i32) -> (i32, i32) {
    %c0_i32 = arith.constant 0 : i32
    %c0_i32_0 = arith.constant 0 : i32
    %c0_i32_1 = arith.constant 0 : i32
    return %c0_i32, %c0_i32_0 : i32, i32
  }
  func.func @transform_5(%arg0: i32, %arg1: i32, %arg2: i32) -> (i32, i32) {
    %c0_i32 = arith.constant 0 : i32
    %c0_i32_0 = arith.constant 0 : i32
    %c0_i32_1 = arith.constant 0 : i32
    return %c0_i32, %c0_i32_0 : i32, i32
  }
  func.func @transform_6(%arg0: i32, %arg1: i32, %arg2: i32) -> (i32, i32) {
    %c0_i32 = arith.constant 0 : i32
    return %arg0, %arg1 : i32, i32
  }
}

</mosaic_0001>

<bundles_post_ra>
// kernel: transformer_encoder.11
= control target key start
LH: loop header
LB: loop body
LE: loop exit
PB: predicated region body
PF: predicated region fallthrough
CT: control target
= control target key end

     0   :  { %s586_s15 = smov 0   ;;  %s588_s16 = smov 0   ;;  %s628_s0 = inlined_call_operand.vmem [shape: f32[16,16], index: 0, kind: input, shape index: {}]   ;;  %s629_s1 = inlined_call_operand.vmem [shape: bf16[16,32], index: 1, kind: input, shape index: {}]   ;;  %s630_s2 = inlined_call_operand.vmem [shape: f32[1,32], index: 2, kind: input, shape index: {}]   ;;  %s631_s3 = inlined_call_operand.vmem [shape: f32[8,32], index: 3, kind: input, shape index: {}]   ;;  %s632_s4 = inlined_call_operand.vmem [shape: bf16[16,32], index: 4, kind: output, shape index: {}]  }
   0x1   :  { %s590_s17 = smov 0  }
   0x2 LB: > { %s33_s18 = sadd.s32 1, %s553_s16  ;;  %p492_p0 = scmp.ge.s32.totalorder %s557_s17, 1  ;;  %s557_s17 = sphi %s590_s17, %s14_s17   ;;  %s553_s16 = sphi %s588_s16, %s634_s16   ;;  %s549_s15 = sphi %s586_s15, %s633_s15  }
   0x3   : > { %p35_p1 = scmp.ge.s32.totalorder %s33_s18, 2  ;;  %p220_p2 = scmp.lt.s32.totalorder %s557_s17, 3 }
   0x5   : > { %s636_s18 = smov (%p35_p1, %s33_s18), 0  ;;  %p221_p3 = pnand %p492_p0, %p220_p2 }
   0x6   : > { %p265_p4 = scmp.lt.s32.totalorder (!%p221_p3), %s549_s15, 1 }
   0x7   : > { %224 = sbr.rel (%p221_p3) target bundleno = 218 (0xda), region = 36 }
   0xc   : > { %v534_v0 = vld [vmem:[%s629_s1] sm:$0xff]   ;;  %v559_v1 = vmov 0.0   ;;  %vm560_vm0 = vmmov 0   ;;  %s638_s15 = smov (!%p265_p4, %s549_s15), 1  ;;  %vm313_vm1 = vcmask 130048   ;;  %vm360_vm2 = vcmask 257024  }
   0xd   : > { %502 = vmatprep.subr.bf16.mxu0 %v559_v1  ;;  %504 = vmatprep.mubr.msk.bf16.mxu0 %vm560_vm0, %v559_v1  ;;  %s493_s21 = sshll.u32 %s638_s15, 3  ;;  %v495_v4 = vld [vmem:[%s630_s2] ss:$0 sm:$0xff]  ;;  %s494_s29 = sshll.u32 %s638_s15, 2 }
   0xe   : > { %503 = vmatpush3.bf16.msra.mxu0 %v534_v0  ;;  %s271_s24 = scalar_lea.vmem %s628_s0, %s493_s21  ;;  %v357_v6 = vld [vmem:[%s631_s3] sm:$0xff]  ;;  %s294_s6 = scalar_lea.vmem %s632_s4, %s494_s29 }
   0xf   : > { %v296_v2 = vld [vmem:[%s271_s24] sm:$0xff] }
  0x10   : > { %v297_v3 = vpack.c.bf16 %v296_v2, %v296_v2 }
  0x12   : > { %505 = vmatmul.mubr.msk.bf16.vlgmr.msra.gmra.mxu0 %vm313_vm1, %v297_v3 }
  0xd2   : > { %v351_v5 = vpop.f32.mrf.mxu0 }
  0xd3   : > { %v352_v7 = vadd.f32 %v495_v4, %v351_v5 }
  0xd4   : > { %v506_v8 = vpop.f32.mrf.mxu0 }
  0xd5   : > { %v358_v9 = vadd.f32 %v357_v6, %v352_v7 }
  0xd6   : > { %v354_v10 = vpop.f32.mrf.mxu0 }
  0xd7   : > { %v359_v11 = vpack.c.bf16 %v358_v9, %v358_v9 }
  0xd8   : > { %v507_v12 = vpop.f32.mrf.mxu0 }
  0xd9   : > { %361 = vst.msk [vmem:[%s294_s6] sm:$0xf] %vm360_vm2, %v359_v11 }
  0xda PF: > { %s14_s17 = sadd.s32 1, %s557_s17   ;;  %s633_s15 = smov %s553_s16 }
  0xdb   : > { %p11_p5 = scmp.ge.s32.totalorder %s14_s17, 4   ;;  %s634_s16 = smov %s636_s18 }
  0xdd   :  { %13 = sbr.rel (!%p11_p5) target bundleno = 2 (0x2), region = 75 }

// kernel: transformer_encoder.12
= control target key start
LH: loop header
LB: loop body
LE: loop exit
PB: predicated region body
PF: predicated region fallthrough
CT: control target
= control target key end

     0   :  { %vm29_vm0 = vcmask 261120   ;;  %v215_v16 = vmov 0.0   ;;  %vm216_vm1 = vmmov 0   ;;  %vm83_vm2 = vcmask 257024   ;;  %s276_s0 = inlined_call_operand.vmem [shape: bf16[16,32], index: 0, kind: input, shape index: {}]   ;;  %s277_s1 = inlined_call_operand.vmem [shape: bf16[32,96], index: 1, kind: input, shape index: {}]   ;;  %s278_s3 = inlined_call_operand.vmem [shape: f32[1,32], index: 3, kind: input, shape index: {}]   ;;  %s279_s4 = inlined_call_operand.vmem [shape: f32[1,32], index: 4, kind: input, shape index: {}]   ;;  %s280_s2 = inlined_call_operand.vmem [shape: f32[1,96], index: 2, kind: input, shape index: {}]   ;;  %s281_s5 = inlined_call_operand.vmem [shape: bf16[16,96], index: 5, kind: output, shape index: {}]  }
   0x1   :  { %v192_v0 = vld [vmem:[%s276_s0] sm:$0xff]   ;;  %v208_v15 = vld [vmem:[%s277_s1 + $0x8] sm:$0xff]   ;;  %198 = vmatprep.subr.bf16.mxu0 %v215_v16  ;;  %202 = vmatprep.mubr.msk.bf16.mxu0 %vm216_vm1, %v215_v16  ;;  %vm169_vm3 = vcmask 781312  }
   0x2   :  { %v193_v1 = vunpack.c.l.bf16 %v192_v0  ;;  %v194_v2 = vunpack.c.h.bf16 %v192_v0  ;;  %199 = vmatpush3.bf16.msra.mxu0 %v208_v15  ;;  %v209_v17 = vld [vmem:[%s277_s1] sm:$0xff]  }
   0x3   :  { %200 = vmatprep.subr.bf16.mxu0 %v215_v16  ;;  %v176_v25 = vld [vmem:[%s278_s3] ss:$0 sm:$0xff] }
   0x4   :  { %v30_v3 = vsel %vm29_vm0, %v193_v1, 0.0  ;;  %v33_v4 = vsel %vm29_vm0, %v194_v2, 0.0  ;;  %v177_v27 = vld [vmem:[%s279_s4] ss:$0 sm:$0xff] }
   0x5   :  { %31 = vadd.xlane.f32.xlu0 %v30_v3  ;;  %v180_v37 = vld [vmem:[%s280_s2] ss:$0 sm:$0xff] }
   0x6   :  { %201 = vmatpush3.bf16.msra.mxu0 %v209_v17 }
   0x9   :  { %34 = vadd.xlane.f32.xlu0 %v33_v4 }
  0x8e   :  { %v32_v5 = vpop.xlane.xlu0 %31 }
  0x8f   :  { %v37_v6 = vmul.f32 0.03125, %v32_v5 }
  0x91   :  { %v39_v7 = vsub.f32 %v193_v1, %v37_v6 }
  0x92   :  { %v35_v8 = vpop.xlane.xlu0 %34 }
  0x93   :  { %v38_v9 = vmul.f32 0.03125, %v35_v8  ;;  %v41_v10 = vmul.f32 %v39_v7, %v39_v7 }
  0x95   :  { %v40_v11 = vsub.f32 %v194_v2, %v38_v9  ;;  %v43_v12 = vsel %vm29_vm0, %v41_v10, 0.0 }
  0x96   :  { %44 = vadd.xlane.f32.xlu1 %v43_v12 }
  0x97   :  { %v42_v13 = vmul.f32 %v40_v11, %v40_v11 }
  0x99   :  { %v46_v14 = vsel %vm29_vm0, %v42_v13, 0.0 }
  0x9a   :  { %47 = vadd.xlane.f32.xlu1 %v46_v14 }
 0x11f   :  { %v45_v18 = vpop.xlane.xlu1 %44 }
 0x120   :  { %v49_v19 = vmul.f32 0.03125, %v45_v18 }
 0x122   :  { %v51_v20 = vadd.f32 1e-05, %v49_v19 }
 0x123   :  { %v48_v21 = vpop.xlane.xlu1 %47 }
 0x124   :  { %211 = vrsqrt.f32 %v51_v20  ;;  %v50_v22 = vmul.f32 0.03125, %v48_v21 }
 0x126   :  { %v52_v23 = vadd.f32 1e-05, %v50_v22 }
 0x128   :  { %213 = vrsqrt.f32 %v52_v23 }
 0x131   :  { %v212_v24 = vpop.eup %211 }
 0x132   :  { %v55_v26 = vmul.f32 %v212_v24, %v39_v7 }
 0x134   :  { %v64_v28 = vmul.f32 %v176_v25, %v55_v26 }
 0x135   :  { %v214_v29 = vpop.eup %213 }
 0x136   :  { %v73_v30 = vadd.f32 %v177_v27, %v64_v28  ;;  %v56_v31 = vmul.f32 %v214_v29, %v40_v11 }
 0x138   :  { %v187_v32 = vpack.c.bf16 %v73_v30, %v73_v30  ;;  %v65_v33 = vmul.f32 %v176_v25, %v56_v31 }
 0x13a   :  { %84 = vst.msk [vmem:[#allocation2] sm:$0xf] %vm83_vm2, %v187_v32  ;;  %v74_v34 = vadd.f32 %v177_v27, %v65_v33 }
 0x13c   :  { %v188_v35 = vpack.c.bf16 %v74_v34, %v74_v34 }
 0x13e   :  { %85 = vst.msk [vmem:[#allocation2 + $0x4] sm:$0xf] %vm83_vm2, %v188_v35 }
 0x145   :  { %v210_v36 = vld [vmem:[#allocation2] sm:$0xff]  }
 0x146   :  { %203 = vmatmul.mubr.msk.bf16.vlgmr.msra.gmra.mxu0 %vm29_vm0, %v210_v36 }
 0x206   :  { %v154_v38 = vpop.f32.mrf.mxu0 }
 0x207   :  { %v155_v39 = vadd.f32 %v180_v37, %v154_v38 }
 0x208   :  { %v204_v40 = vpop.f32.mrf.mxu0 }
 0x209   :  { %v189_v41 = vpack.c.bf16 %v155_v39, %v155_v39 }
 0x20a   :  { %v157_v42 = vpop.f32.mrf.mxu0 }
 0x20b   :  { %170 = vst.msk [vmem:[%s281_s5] sm:$0xf] %vm169_vm3, %v189_v41  ;;  %v158_v43 = vadd.f32 %v180_v37, %v157_v42 }
 0x20c   :  { %v205_v44 = vpop.f32.mrf.mxu0 }
 0x20d   :  { %v190_v45 = vpack.c.bf16 %v158_v43, %v158_v43 }
 0x20f   :  { %171 = vst.msk [vmem:[%s281_s5 + $0x4] sm:$0xf] %vm169_vm3, %v190_v45 }

// kernel: transformer_encoder.14
= control target key start
LH: loop header
LB: loop body
LE: loop exit
PB: predicated region body
PF: predicated region fallthrough
CT: control target
= control target key end

     0   :  { %v143_v0 = vmov 0.0   ;;  %vm144_vm0 = vmmov 0   ;;  %vm48_vm1 = vcmask 261120   ;;  %vm107_vm2 = vcmask 257024   ;;  %s191_s1 = inlined_call_operand.vmem [shape: bf16[32,32], index: 1, kind: input, shape index: {}]   ;;  %s192_s0 = inlined_call_operand.vmem [shape: bf16[16,32], index: 0, kind: input, shape index: {}]   ;;  %s193_s3 = inlined_call_operand.vmem [shape: bf16[16,32], index: 3, kind: input, shape index: {}]   ;;  %s194_s2 = inlined_call_operand.vmem [shape: f32[1,32], index: 2, kind: input, shape index: {}]   ;;  %s195_s4 = inlined_call_operand.vmem [shape: bf16[16,32], index: 4, kind: output, shape index: {}]  }
   0x1   :  { %130 = vmatprep.subr.bf16.mxu0 %v143_v0  ;;  %v140_v1 = vld [vmem:[%s191_s1 + $0x8] sm:$0xff]   ;;  %134 = vmatprep.mubr.msk.bf16.mxu0 %vm144_vm0, %v143_v0  ;;  %v141_v2 = vld [vmem:[%s191_s1] sm:$0xff]  }
   0x2   :  { %131 = vmatpush3.bf16.msra.mxu0 %v140_v1  ;;  %v142_v3 = vld [vmem:[%s192_s0] sm:$0xff]  }
   0x3   :  { %132 = vmatprep.subr.bf16.mxu0 %v143_v0  ;;  %v124_v4 = vld [vmem:[%s193_s3] sm:$0xff]  }
   0x4   :  { %v114_v5 = vld [vmem:[%s194_s2] ss:$0 sm:$0xff]  ;;  %v125_v6 = vunpack.c.l.bf16 %v124_v4  ;;  %v126_v11 = vunpack.c.h.bf16 %v124_v4 }
   0x6   :  { %133 = vmatpush3.bf16.msra.mxu0 %v141_v2 }
   0x9   :  { %135 = vmatmul.mubr.msk.bf16.vlgmr.msra.gmra.mxu0 %vm48_vm1, %v142_v3 }
  0xc9   :  { %v86_v7 = vpop.f32.mrf.mxu0 }
  0xca   :  { %v87_v8 = vadd.f32 %v114_v5, %v86_v7 }
  0xcb   :  { %v136_v9 = vpop.f32.mrf.mxu0 }
  0xcc   :  { %v97_v10 = vadd.f32 %v125_v6, %v87_v8 }
  0xcd   :  { %v89_v12 = vpop.f32.mrf.mxu0 }
  0xce   :  { %v121_v13 = vpack.c.bf16 %v97_v10, %v97_v10  ;;  %v90_v14 = vadd.f32 %v114_v5, %v89_v12 }
  0xcf   :  { %v137_v15 = vpop.f32.mrf.mxu0 }
  0xd0   :  { %108 = vst.msk [vmem:[%s195_s4] sm:$0xf] %vm107_vm2, %v121_v13  ;;  %v98_v16 = vadd.f32 %v126_v11, %v90_v14 }
  0xd2   :  { %v122_v17 = vpack.c.bf16 %v98_v16, %v98_v16 }
  0xd4   :  { %109 = vst.msk [vmem:[%s195_s4 + $0x4] sm:$0xf] %vm107_vm2, %v122_v17 }

// kernel: transformer_encoder.13
= control target key start
LH: loop header
LB: loop body
LE: loop exit
PB: predicated region body
PF: predicated region fallthrough
CT: control target
= control target key end

     0   :  { %s859_s9 = smov 0   ;;  %s960_s0 = inlined_call_operand.vmem [shape: bf16[2,8,96], index: 0, kind: input, shape index: {}]   ;;  %s961_s1 = inlined_call_operand.vmem [shape: f32[2,1,8], index: 1, kind: input, shape index: {}]   ;;  %s962_s2 = inlined_call_operand.vmem [shape: bf16[2,8,32], index: 2, kind: output, shape index: {}]  }
   0x1 LB: > { %s695_s10 = sadd.s32 4294967295, %s825_s9   ;;  %p699_p0 = scmp.ge.s32.totalorder %s825_s9, 1  ;;  %s825_s9 = sphi %s859_s9, %s12_s9  }
   0x2   : > { %p119_p1 = scmp.lt.s32.totalorder %s825_s9, 3 }
   0x4   : > { %p120_p2 = pnand %p699_p0, %p119_p1 }
   0x5   : > { %p142_p3 = scmp.lt.s32.totalorder (!%p120_p2), %s695_s10, 1  ;;  %s829_s15 = smov (!%p120_p2), 120  }
   0x6   : > { %123 = sbr.rel (%p120_p2) target bundleno = 1544 (0x608), region = 28  ;;  %s830_s16 = smov (!%p120_p2), 112  }
   0x7   : > { %s831_s17 = smov (!%p120_p2), 96   ;;  %s833_s21 = smov (!%p120_p2), 48  }
   0x8   : > { %s834_s22 = smov (!%p120_p2), 104   ;;  %s835_s23 = smov (!%p120_p2), 72  }
   0x9   : > { %s836_s24 = smov (!%p120_p2), 80   ;;  %s837_s25 = smov (!%p120_p2), 56  }
   0xa   : > { %s838_s26 = smov (!%p120_p2), 88   ;;  %s839_s27 = smov (!%p120_p2), 64  }
   0xb   : > { %v827_v0 = vmov 0.0   ;;  %vm828_vm0 = vmmov 0   ;;  %s964_s10 = smov (!%p142_p3, %s695_s10), 1  ;;  %vm162_vm1 = vcmask 64512   ;;  %v210_v5 = vlaneseq  ;;  %s840_s28 = smov 40  }
   0xc   : > { %729 = vmatprep.subr.bf16.mxu0 %v827_v0  ;;  %731 = vmatprep.mubr.msk.bf16.mxu0 %vm828_vm0, %v827_v0  ;;  %s700_s11 = sshll.u32 %s964_s10, 2  ;;  %s148_s20 = scalar_lea.vmem %s961_s1, %s964_s10  ;;  %v832_v9 = vmov 0   ;;  %vm233_vm4 = vcmask 1043456   ;;  %vm393_vm5 = vcmask 130112   ;;  %vm510_vm6 = vcmask 195712  }
   0xd   : > { %735 = vmatprep.subr.bf16.mxu1 %v827_v0  ;;  %737 = vmatprep.mubr.msk.bf16.mxu1 %vm828_vm0, %v827_v0  ;;  %s145_s14 = scalar_lea.vmem %s960_s0, %s700_s11  ;;  %v155_v6 = vld [vmem:[%s148_s20] sm:$0x1]  ;;  %v211_v7 = vshrl.u32 %v210_v5, 7  ;;  %s841_s29 = smov 8   ;;  %vm627_vm7 = vcmask 261312   ;;  %vm631_vm8 = vcmask 257024  }
   0xe   : > { %v154_v1 = vld [vmem:[%s145_s14] sm:$0xf]  ;;  %vm156_vm2 = vcmp.gt.f32.partialorder %v155_v6, 0.5  ;;  %s842_s30 = smov 16   ;;  %s843_s3 = smov 24  }
   0xf   : > { %v881_v2 = vcombine.low %v154_v1, %v154_v1  ;;  %v212_v8 = vsub.s32 0, %v211_v7  ;;  %v209_v10 = vsel %vm156_vm2, 1, %v832_v9  ;;  %s152_s6 = scalar_lea.vmem %s962_s2, %s700_s11 }
  0x11   : > { %160 = vrot.lane.b32.xlu0 %v881_v2, %s829_s15  ;;  %228 = vrot.lane.b32.xlu1 %v881_v2, %s830_s16  ;;  %v895_v11 = vrot.slane %v209_v10, %v212_v8 }
  0x13   : > { %vm214_vm3 = vcmp.eq.s32.totalorder %v895_v11, 1 }
  0x15   : > { %280 = vrot.lane.b32.xlu1 %v881_v2, %s831_s17 }
  0x83   : > { %v161_v3 = vpop.permute.xlu0 %160  ;;  %v229_v18 = vpop.permute.xlu1 %228 }
  0x84   : > { %v167_v4 = vsel %vm162_vm1, %v161_v3, 0  ;;  %v235_v19 = vsel %vm233_vm4, %v229_v18, 0 }
  0x85   : > { %730 = vmatpush3.bf16.xpose.msra.mxu0 %v167_v4  ;;  %736 = vmatpush3.bf16.msra.mxu1 %v235_v19 }
  0x86   : > { %747 = vmatprep.subr.bf16.mxu0 %v827_v0  ;;  %741 = vmatprep.subr.bf16.mxu1 %v827_v0 }
  0x87   : > { %v281_v25 = vpop.permute.xlu1 %280 }
  0x88   : > { %v286_v31 = vsel %vm162_vm1, %v281_v25, 0 }
  0x8c   : > { %732 = vmatmul.mubr.msk.bf16.vlgmr.msra.gmra.mxu0 %vm162_vm1, %v154_v1 }
  0x8d   : > { %749 = vmatprep.mubr.msk.bf16.mxu0 %vm828_vm0, %v827_v0 }
 0x14c   : > { %v203_v12 = vpop.f32.mrf.mxu0 }
 0x14d   : > { %v215_v13 = vsel %vm214_vm3, -1e+30, %v203_v12 }
 0x14e   : > { %v733_v14 = vpop.f32.mrf.mxu0  ;;  %v216_v15 = vsel %vm162_vm1, %v215_v13, -inf }
 0x14f   : > { %217 = vmax.xlane.f32.xlu0 %v216_v15 }
 0x150   : > { %v206_v16 = vpop.f32.mrf.mxu0 }
 0x152   : > { %v734_v17 = vpop.f32.mrf.mxu0 }
 0x165   : > { %514 = vrot.lane.b32.xlu0 %v881_v2, %s833_s21 }
 0x1d8   : > { %v218_v20 = vpop.xlane.xlu0 %217 }
 0x1d9   : > { %v219_v21 = vsub.f32 %v215_v13, %v218_v20 }
 0x1db   : > { %v220_v22 = vmul.f32 1.442695, %v219_v21 }
 0x1dc   : > { %v515_v34 = vpop.permute.xlu0 %514 }
 0x1dd   : > { %803 = vpow2.f32 %v220_v22  ;;  %v520_v36 = vsel %vm162_vm1, %v515_v34, 0 }
 0x1ea   : > { %v804_v23 = vpop.eup %803 }
 0x1eb   : > { %v222_v24 = vsel %vm162_vm1, %v804_v23, 0.0 }
 0x1ec   : > { %223 = vadd.xlane.f32.xlu1 %v222_v24 }
 0x1fd   : > { %278 = vrot.lane.b32.xlu1 %v881_v2, %s834_s22 }
 0x201   : > { %397 = vrot.lane.b32.xlu1 %v881_v2, %s835_s23 }
 0x205   : > { %395 = vrot.lane.b32.xlu1 %v881_v2, %s836_s24 }
 0x209   : > { %512 = vrot.lane.b32.xlu1 %v881_v2, %s837_s25 }
 0x275   : > { %v224_v26 = vpop.xlane.xlu1 %223 }
 0x276   : > { %805 = vrcp.f32 %v224_v26 }
 0x279   : > { %v279_v29 = vpop.permute.xlu1 %278 }
 0x27d   : > { %v398_v32 = vpop.permute.xlu1 %397 }
 0x27e   : > { %v403_v33 = vsel %vm162_vm1, %v398_v32, 0 }
 0x281   : > { %v396_v35 = vpop.permute.xlu1 %395 }
 0x283   : > { %v806_v27 = vpop.eup %805 }
 0x284   : > { %v226_v28 = vmul.f32 %v806_v27, %v804_v23 }
 0x285   : > { %v513_v37 = vpop.permute.xlu1 %512 }
 0x286   : > { %v227_v30 = vpack.c.bf16 %v226_v28, %v226_v28 }
 0x288   : > { %738 = vmatmul.mubr.msk.bf16.vlgmr.msra.gmra.mxu1 %vm162_vm1, %v227_v30 }
 0x289   : > { %742 = vmatpush3.bf16.xpose.msra.mxu1 %v286_v31  ;;  %743 = vmatprep.mubr.msk.bf16.mxu1 %vm828_vm0, %v827_v0 }
 0x28a   : > { %753 = vmatprep.subr.bf16.mxu1 %v827_v0 }
 0x290   : > { %744 = vmatmul.mubr.msk.bf16.vlgmr.msra.gmra.mxu1 %vm162_vm1, %v279_v29 }
 0x291   : > { %754 = vmatpush3.bf16.xpose.msra.mxu1 %v403_v33  ;;  %755 = vmatprep.mubr.msk.bf16.mxu1 %vm828_vm0, %v827_v0 }
 0x292   : > { %765 = vmatprep.subr.bf16.mxu1 %v827_v0 }
 0x298   : > { %756 = vmatmul.mubr.msk.bf16.vlgmr.msra.gmra.mxu1 %vm162_vm1, %v396_v35 }
 0x299   : > { %766 = vmatpush3.bf16.xpose.msra.mxu1 %v520_v36  ;;  %767 = vmatprep.mubr.msk.bf16.mxu1 %vm828_vm0, %v827_v0 }
 0x2a0   : > { %768 = vmatmul.mubr.msk.bf16.vlgmr.msra.gmra.mxu1 %vm162_vm1, %v513_v37 }
 0x348   : > { %v271_v38 = vpop.f32.mrf.mxu1 }
 0x349   : > { %277 = vst.msk [vmem:[#allocation2] sm:$0xff] %vm162_vm1, %v271_v38 }
 0x34a   : > { %v739_v39 = vpop.f32.mrf.mxu1 }
 0x34c   : > { %v274_v40 = vpop.f32.mrf.mxu1 }
 0x34e   : > { %v740_v41 = vpop.f32.mrf.mxu1 }
 0x350   : > { %v322_v42 = vpop.f32.mrf.mxu1 }
 0x351   : > { %v328_v43 = vsel %vm214_vm3, -1e+30, %v322_v42 }
 0x352   : > { %v745_v44 = vpop.f32.mrf.mxu1  ;;  %v329_v45 = vsel %vm162_vm1, %v328_v43, -inf }
 0x353   : > { %330 = vmax.xlane.f32.xlu1 %v329_v45 }
 0x354   : > { %v325_v46 = vpop.f32.mrf.mxu1 }
 0x356   : > { %v746_v47 = vpop.f32.mrf.mxu1 }
 0x358   : > { %v439_v48 = vpop.f32.mrf.mxu1 }
 0x359   : > { %v445_v49 = vsel %vm214_vm3, -1e+30, %v439_v48 }
 0x35a   : > { %v757_v50 = vpop.f32.mrf.mxu1  ;;  %v446_v51 = vsel %vm162_vm1, %v445_v49, -inf }
 0x35b   : > { %447 = vmax.xlane.f32.xlu0 %v446_v51 }
 0x35c   : > { %v442_v52 = vpop.f32.mrf.mxu1 }
 0x35e   : > { %v758_v53 = vpop.f32.mrf.mxu1 }
 0x360   : > { %v556_v54 = vpop.f32.mrf.mxu1 }
 0x361   : > { %v562_v55 = vsel %vm214_vm3, -1e+30, %v556_v54 }
 0x362   : > { %v563_v56 = vsel %vm162_vm1, %v562_v55, -inf  ;;  %v769_v57 = vpop.f32.mrf.mxu1 }
 0x363   : > { %564 = vmax.xlane.f32.xlu1 %v563_v56 }
 0x364   : > { %v559_v58 = vpop.f32.mrf.mxu1 }
 0x366   : > { %v770_v59 = vpop.f32.mrf.mxu1 }
 0x3dc   : > { %v331_v60 = vpop.xlane.xlu1 %330 }
 0x3dd   : > { %v332_v61 = vsub.f32 %v328_v43, %v331_v60 }
 0x3df   : > { %v333_v62 = vmul.f32 1.442695, %v332_v61 }
 0x3e1   : > { %807 = vpow2.f32 %v333_v62 }
 0x3e4   : > { %v448_v8 = vpop.xlane.xlu0 %447 }
 0x3e5   : > { %v449_v9 = vsub.f32 %v445_v49, %v448_v8 }
 0x3e7   : > { %v450_v10 = vmul.f32 1.442695, %v449_v9 }
 0x3ec   : > { %v565_v63 = vpop.xlane.xlu1 %564 }
 0x3ed   : > { %v566_v1 = vsub.f32 %v562_v55, %v565_v63 }
 0x3ee   : > { %v808_v3 = vpop.eup %807 }
 0x3ef   : > { %v567_v4 = vmul.f32 1.442695, %v566_v1  ;;  %v335_v5 = vsel %vm162_vm1, %v808_v3, 0.0 }
 0x3f0   : > { %336 = vadd.xlane.f32.xlu1 %v335_v5 }
 0x3f1   : > { %809 = vpow2.f32 %v567_v4 }
 0x3f2   : > { %811 = vpow2.f32 %v450_v10 }
 0x3fe   : > { %v810_v6 = vpop.eup %809 }
 0x3ff   : > { %v569_v7 = vsel %vm162_vm1, %v810_v6, 0.0  ;;  %v812_v11 = vpop.eup %811 }
 0x400   : > { %570 = vadd.xlane.f32.xlu0 %v569_v7  ;;  %v452_v12 = vsel %vm162_vm1, %v812_v11, 0.0 }
 0x401   : > { %341 = vrot.lane.b32.xlu1 %v881_v2, %s838_s26 }
 0x416   : > { %458 = vrot.lane.b32.xlu0 %v881_v2, %s839_s27 }
 0x425   : > { %453 = vadd.xlane.f32.xlu1 %v452_v12 }
 0x436   : > { %575 = vrot.lane.b32.xlu1 %v881_v2, %s840_s28 }
 0x479   : > { %v337_v13 = vpop.xlane.xlu1 %336 }
 0x47a   : > { %813 = vrcp.f32 %v337_v13 }
 0x47d   : > { %v342_v14 = vpop.permute.xlu1 %341 }
 0x47e   : > { %v347_v15 = vsel %vm233_vm4, %v342_v14, 0 }
 0x47f   : > { %748 = vmatpush3.bf16.msra.mxu0 %v347_v15 }
 0x480   : > { %759 = vmatprep.subr.bf16.mxu0 %v827_v0 }
 0x487   : > { %v814_v16 = vpop.eup %813 }
 0x488   : > { %v339_v17 = vmul.f32 %v814_v16, %v808_v3 }
 0x489   : > { %v571_v18 = vpop.xlane.xlu0 %570 }
 0x48a   : > { %v340_v19 = vpack.c.bf16 %v339_v17, %v339_v17 }
 0x48c   : > { %750 = vmatmul.mubr.msk.bf16.vlgmr.msra.gmra.mxu0 %vm162_vm1, %v340_v19 }
 0x48d   : > { %v459_v20 = vpop.permute.xlu0 %458  ;;  %761 = vmatprep.mubr.msk.bf16.mxu0 %vm828_vm0, %v827_v0 }
 0x48e   : > { %v464_v2 = vsel %vm233_vm4, %v459_v20, 0 }
 0x48f   : > { %760 = vmatpush3.bf16.msra.mxu0 %v464_v2 }
 0x490   : > { %771 = vmatprep.subr.bf16.mxu0 %v827_v0 }
 0x4ae   : > { %v454_v21 = vpop.xlane.xlu1 %453 }
 0x4af   : > { %815 = vrcp.f32 %v454_v21 }
 0x4b0   : > { %817 = vrcp.f32 %v571_v18 }
 0x4b2   : > { %v576_v23 = vpop.permute.xlu1 %575 }
 0x4b3   : > { %v581_v25 = vsel %vm233_vm4, %v576_v23, 0 }
 0x4bc   : > { %v816_v22 = vpop.eup %815 }
 0x4bd   : > { %v456_v24 = vmul.f32 %v816_v22, %v812_v11  ;;  %v818_v27 = vpop.eup %817 }
 0x4be   : > { %v573_v28 = vmul.f32 %v818_v27, %v810_v6 }
 0x4bf   : > { %v457_v26 = vpack.c.bf16 %v456_v24, %v456_v24 }
 0x4c0   : > { %v574_v29 = vpack.c.bf16 %v573_v28, %v573_v28 }
 0x4c1   : > { %762 = vmatmul.mubr.msk.bf16.vlgmr.msra.gmra.mxu0 %vm162_vm1, %v457_v26 }
 0x4c2   : > { %772 = vmatpush3.bf16.msra.mxu0 %v581_v25  ;;  %773 = vmatprep.mubr.msk.bf16.mxu0 %vm828_vm0, %v827_v0 }
 0x4c9   : > { %774 = vmatmul.mubr.msk.bf16.vlgmr.msra.gmra.mxu0 %vm162_vm1, %v574_v29 }
 0x54c   : > { %v383_v30 = vpop.f32.mrf.mxu0 }
 0x54d   : > { %390 = vrot.lane.b32.xlu1 %v383_v30, %s841_s29 }
 0x54e   : > { %v751_v31 = vpop.f32.mrf.mxu0 }
 0x550   : > { %v386_v32 = vpop.f32.mrf.mxu0 }
 0x552   : > { %v752_v33 = vpop.f32.mrf.mxu0 }
 0x581   : > { %v500_v34 = vpop.f32.mrf.mxu0 }
 0x582   : > { %507 = vrot.lane.b32.xlu0 %v500_v34, %s842_s30 }
 0x583   : > { %v763_v35 = vpop.f32.mrf.mxu0 }
 0x585   : > { %v503_v36 = vpop.f32.mrf.mxu0 }
 0x587   : > { %v764_v37 = vpop.f32.mrf.mxu0 }
 0x589   : > { %v617_v38 = vpop.f32.mrf.mxu0 }
 0x58a   : > { %624 = vrot.lane.b32.xlu1 %v617_v38, %s843_s3 }
 0x58b   : > { %v775_v0 = vpop.f32.mrf.mxu0 }
 0x58d   : > { %v620_v39 = vpop.f32.mrf.mxu0 }
 0x58f   : > { %v776_v40 = vpop.f32.mrf.mxu0 }
 0x5bf   : > { %v391_v41 = vpop.permute.xlu1 %390 }
 0x5c0   : > { %394 = vst.msk [vmem:[#allocation2] sm:$0xff] %vm393_vm5, %v391_v41 }
 0x5f4   : > { %v508_v42 = vpop.permute.xlu0 %507 }
 0x5f5   : > { %511 = vst.msk [vmem:[#allocation2] sm:$0xff] %vm510_vm6, %v508_v42 }
 0x5fc   : > { %v625_v43 = vpop.permute.xlu1 %624 }
 0x5fd   : > { %628 = vst.msk [vmem:[#allocation2] sm:$0xff] %vm627_vm7, %v625_v43 }
 0x604   : > { %v629_v44 = vld [vmem:[#allocation2] sm:$0xff] }
 0x605   : > { %v630_v45 = vpack.c.bf16 %v629_v44, %v629_v44 }
 0x607   : > { %632 = vst.msk [vmem:[%s152_s6] sm:$0xf] %vm631_vm8, %v630_v45 }
 0x608 PF: > { %s12_s9 = sadd.s32 1, %s825_s9  }
 0x609   : > { %p9_p4 = scmp.ge.s32.totalorder %s12_s9, 4  }
 0x60b   :  { %11 = sbr.rel (!%p9_p4) target bundleno = 1 (0x1), region = 61 }

// kernel: transformer_encoder.15
= control target key start
LH: loop header
LB: loop body
LE: loop exit
PB: predicated region body
PF: predicated region fallthrough
CT: control target
= control target key end

     0   :  { %vm29_vm0 = vcmask 261120   ;;  %v217_v16 = vmov 0.0   ;;  %vm218_vm1 = vmmov 0   ;;  %vm83_vm2 = vcmask 257024   ;;  %s278_s0 = inlined_call_operand.vmem [shape: bf16[16,32], index: 0, kind: input, shape index: {}]   ;;  %s279_s1 = inlined_call_operand.vmem [shape: bf16[32,64], index: 1, kind: input, shape index: {}]   ;;  %s280_s3 = inlined_call_operand.vmem [shape: f32[1,32], index: 3, kind: input, shape index: {}]   ;;  %s281_s4 = inlined_call_operand.vmem [shape: f32[1,32], index: 4, kind: input, shape index: {}]   ;;  %s282_s2 = inlined_call_operand.vmem [shape: f32[1,64], index: 2, kind: input, shape index: {}]   ;;  %s283_s5 = inlined_call_operand.vmem [shape: bf16[16,64], index: 5, kind: output, shape index: {}]  }
   0x1   :  { %v194_v0 = vld [vmem:[%s278_s0] sm:$0xff]   ;;  %v210_v15 = vld [vmem:[%s279_s1 + $0x8] sm:$0xff]   ;;  %200 = vmatprep.subr.bf16.mxu0 %v217_v16  ;;  %204 = vmatprep.mubr.msk.bf16.mxu0 %vm218_vm1, %v217_v16  ;;  %vm171_vm3 = vcmask 519168  }
   0x2   :  { %v195_v1 = vunpack.c.l.bf16 %v194_v0  ;;  %v196_v2 = vunpack.c.h.bf16 %v194_v0  ;;  %201 = vmatpush3.bf16.msra.mxu0 %v210_v15  ;;  %v211_v17 = vld [vmem:[%s279_s1] sm:$0xff]  }
   0x3   :  { %202 = vmatprep.subr.bf16.mxu0 %v217_v16  ;;  %v178_v25 = vld [vmem:[%s280_s3] ss:$0 sm:$0xff] }
   0x4   :  { %v30_v3 = vsel %vm29_vm0, %v195_v1, 0.0  ;;  %v33_v4 = vsel %vm29_vm0, %v196_v2, 0.0  ;;  %v179_v27 = vld [vmem:[%s281_s4] ss:$0 sm:$0xff] }
   0x5   :  { %31 = vadd.xlane.f32.xlu0 %v30_v3  ;;  %v182_v37 = vld [vmem:[%s282_s2] ss:$0 sm:$0xff] }
   0x6   :  { %203 = vmatpush3.bf16.msra.mxu0 %v211_v17 }
   0x9   :  { %34 = vadd.xlane.f32.xlu0 %v33_v4 }
  0x8e   :  { %v32_v5 = vpop.xlane.xlu0 %31 }
  0x8f   :  { %v37_v6 = vmul.f32 0.03125, %v32_v5 }
  0x91   :  { %v39_v7 = vsub.f32 %v195_v1, %v37_v6 }
  0x92   :  { %v35_v8 = vpop.xlane.xlu0 %34 }
  0x93   :  { %v38_v9 = vmul.f32 0.03125, %v35_v8  ;;  %v41_v10 = vmul.f32 %v39_v7, %v39_v7 }
  0x95   :  { %v40_v11 = vsub.f32 %v196_v2, %v38_v9  ;;  %v43_v12 = vsel %vm29_vm0, %v41_v10, 0.0 }
  0x96   :  { %44 = vadd.xlane.f32.xlu1 %v43_v12 }
  0x97   :  { %v42_v13 = vmul.f32 %v40_v11, %v40_v11 }
  0x99   :  { %v46_v14 = vsel %vm29_vm0, %v42_v13, 0.0 }
  0x9a   :  { %47 = vadd.xlane.f32.xlu1 %v46_v14 }
 0x11f   :  { %v45_v18 = vpop.xlane.xlu1 %44 }
 0x120   :  { %v49_v19 = vmul.f32 0.03125, %v45_v18 }
 0x122   :  { %v51_v20 = vadd.f32 1e-05, %v49_v19 }
 0x123   :  { %v48_v21 = vpop.xlane.xlu1 %47 }
 0x124   :  { %213 = vrsqrt.f32 %v51_v20  ;;  %v50_v22 = vmul.f32 0.03125, %v48_v21 }
 0x126   :  { %v52_v23 = vadd.f32 1e-05, %v50_v22 }
 0x128   :  { %215 = vrsqrt.f32 %v52_v23 }
 0x131   :  { %v214_v24 = vpop.eup %213 }
 0x132   :  { %v55_v26 = vmul.f32 %v214_v24, %v39_v7 }
 0x134   :  { %v64_v28 = vmul.f32 %v178_v25, %v55_v26 }
 0x135   :  { %v216_v29 = vpop.eup %215 }
 0x136   :  { %v73_v30 = vadd.f32 %v179_v27, %v64_v28  ;;  %v56_v31 = vmul.f32 %v216_v29, %v40_v11 }
 0x138   :  { %v189_v32 = vpack.c.bf16 %v73_v30, %v73_v30  ;;  %v65_v33 = vmul.f32 %v178_v25, %v56_v31 }
 0x13a   :  { %84 = vst.msk [vmem:[#allocation2] sm:$0xf] %vm83_vm2, %v189_v32  ;;  %v74_v34 = vadd.f32 %v179_v27, %v65_v33 }
 0x13c   :  { %v190_v35 = vpack.c.bf16 %v74_v34, %v74_v34 }
 0x13e   :  { %85 = vst.msk [vmem:[#allocation2 + $0x4] sm:$0xf] %vm83_vm2, %v190_v35 }
 0x145   :  { %v212_v36 = vld [vmem:[#allocation2] sm:$0xff]  }
 0x146   :  { %205 = vmatmul.mubr.msk.bf16.vlgmr.msra.gmra.mxu0 %vm29_vm0, %v212_v36 }
 0x206   :  { %v154_v38 = vpop.f32.mrf.mxu0 }
 0x207   :  { %v155_v39 = vadd.f32 %v182_v37, %v154_v38 }
 0x208   :  { %v206_v40 = vpop.f32.mrf.mxu0 }
 0x209   :  { %v161_v41 = vmax.f32 %v155_v39, 0.0 }
 0x20a   :  { %v157_v42 = vpop.f32.mrf.mxu0 }
 0x20b   :  { %v191_v43 = vpack.c.bf16 %v161_v41, %v161_v41  ;;  %v158_v44 = vadd.f32 %v182_v37, %v157_v42 }
 0x20c   :  { %v207_v45 = vpop.f32.mrf.mxu0 }
 0x20d   :  { %172 = vst.msk [vmem:[%s283_s5] sm:$0xf] %vm171_vm3, %v191_v43  ;;  %v162_v46 = vmax.f32 %v158_v44, 0.0 }
 0x20f   :  { %v192_v47 = vpack.c.bf16 %v162_v46, %v162_v46 }
 0x211   :  { %173 = vst.msk [vmem:[%s283_s5 + $0x4] sm:$0xf] %vm171_vm3, %v192_v47 }

// kernel: transformer_encoder.16
= control target key start
LH: loop header
LB: loop body
LE: loop exit
PB: predicated region body
PF: predicated region fallthrough
CT: control target
= control target key end

     0   :  { %v169_v0 = vmov 0.0   ;;  %vm170_vm0 = vmmov 0   ;;  %vm64_vm1 = vcmask 523264   ;;  %vm123_vm2 = vcmask 257024   ;;  %s223_s1 = inlined_call_operand.vmem [shape: bf16[64,32], index: 1, kind: input, shape index: {}]   ;;  %s224_s0 = inlined_call_operand.vmem [shape: bf16[16,64], index: 0, kind: input, shape index: {}]   ;;  %s225_s3 = inlined_call_operand.vmem [shape: bf16[16,32], index: 3, kind: input, shape index: {}]   ;;  %s226_s2 = inlined_call_operand.vmem [shape: f32[1,32], index: 2, kind: input, shape index: {}]   ;;  %s227_s4 = inlined_call_operand.vmem [shape: bf16[16,32], index: 4, kind: output, shape index: {}]  }
   0x1   :  { %150 = vmatprep.subr.bf16.mxu0 %v169_v0  ;;  %v164_v1 = vld [vmem:[%s223_s1 + $0x18] sm:$0xff]   ;;  %158 = vmatprep.mubr.msk.bf16.mxu0 %vm170_vm0, %v169_v0  ;;  %v165_v2 = vld [vmem:[%s223_s1 + $0x10] sm:$0xff]   ;;  %v166_v3 = vld [vmem:[%s223_s1 + $0x8] sm:$0xff]  }
   0x2   :  { %151 = vmatpush3.bf16.msra.mxu0 %v164_v1  ;;  %v167_v4 = vld [vmem:[%s223_s1] sm:$0xff]  }
   0x3   :  { %152 = vmatprep.subr.bf16.mxu0 %v169_v0  ;;  %v168_v5 = vld [vmem:[%s224_s0] sm:$0xff]  }
   0x4   :  { %v142_v6 = vld [vmem:[%s225_s3] sm:$0xff]  }
   0x5   :  { %v130_v7 = vld [vmem:[%s226_s2] ss:$0 sm:$0xff]  ;;  %v143_v8 = vunpack.c.l.bf16 %v142_v6  ;;  %v144_v13 = vunpack.c.h.bf16 %v142_v6 }
   0x6   :  { %153 = vmatpush3.bf16.msra.mxu0 %v165_v2 }
   0x7   :  { %154 = vmatprep.subr.bf16.mxu0 %v169_v0 }
   0xa   :  { %155 = vmatpush3.bf16.msra.mxu0 %v166_v3 }
   0xb   :  { %156 = vmatprep.subr.bf16.mxu0 %v169_v0 }
   0xe   :  { %157 = vmatpush3.bf16.msra.mxu0 %v167_v4 }
  0x11   :  { %159 = vmatmul.mubr.msk.bf16.vlgmr.msra.gmra.mxu0 %vm64_vm1, %v168_v5 }
  0xd1   :  { %v102_v9 = vpop.f32.mrf.mxu0 }
  0xd2   :  { %v103_v10 = vadd.f32 %v130_v7, %v102_v9 }
  0xd3   :  { %v160_v11 = vpop.f32.mrf.mxu0 }
  0xd4   :  { %v113_v12 = vadd.f32 %v143_v8, %v103_v10 }
  0xd5   :  { %v105_v14 = vpop.f32.mrf.mxu0 }
  0xd6   :  { %v139_v15 = vpack.c.bf16 %v113_v12, %v113_v12  ;;  %v106_v16 = vadd.f32 %v130_v7, %v105_v14 }
  0xd7   :  { %v161_v17 = vpop.f32.mrf.mxu0 }
  0xd8   :  { %124 = vst.msk [vmem:[%s227_s4] sm:$0xf] %vm123_vm2, %v139_v15  ;;  %v114_v18 = vadd.f32 %v144_v13, %v106_v16 }
  0xda   :  { %v140_v19 = vpack.c.bf16 %v114_v18, %v114_v18 }
  0xdc   :  { %125 = vst.msk [vmem:[%s227_s4 + $0x4] sm:$0xf] %vm123_vm2, %v140_v19 }

// kernel: transformer_encoder.21
= control target key start
LH: loop header
LB: loop body
LE: loop exit
PB: predicated region body
PF: predicated region fallthrough
CT: control target
= control target key end

     0   :  { %v252_v1 = vmov 0.0   ;;  %vm253_vm0 = vmmov 0   ;;  %s328_s0 = inlined_call_operand.vmem [shape: bf16[16,64], index: 0, kind: input, shape index: {}]   ;;  %s329_s1 = inlined_call_operand.vmem [shape: bf16[64,32], index: 1, kind: input, shape index: {}]   ;;  %s330_s2 = inlined_call_operand.vmem [shape: f32[1,32], index: 2, kind: input, shape index: {}]   ;;  %s331_s3 = inlined_call_operand.vmem [shape: bf16[16,32], index: 3, kind: input, shape index: {}]   ;;  %s332_s4 = inlined_call_operand.vmem [shape: f32[1,32], index: 4, kind: input, shape index: {}]   ;;  %s333_s5 = inlined_call_operand.vmem [shape: f32[1,32], index: 5, kind: input, shape index: {}]   ;;  %s334_s6 = inlined_call_operand.hbm [shape: f32[16,32], index: 6, kind: output, shape index: {}]  }
   0x1   :  { %v221_v0 = vld [vmem:[%s329_s1 + $0x18] sm:$0xff]   ;;  %204 = vmatprep.subr.bf16.mxu0 %v252_v1  ;;  %v222_v2 = vld [vmem:[%s329_s1 + $0x10] sm:$0xff]   ;;  %212 = vmatprep.mubr.msk.bf16.mxu0 %vm253_vm0, %v252_v1 }
   0x2   :  { %205 = vmatpush3.bf16.msra.mxu0 %v221_v0 }
   0x3   :  { %206 = vmatprep.subr.bf16.mxu0 %v252_v1 }
   0x4   :  { %11 = vsyncpa [#allocation3], 0  ;;  %v223_v3 = vld [vmem:[%s329_s1 + $0x8] sm:$0xff]   ;;  %v224_v4 = vld [vmem:[%s329_s1] sm:$0xff]   ;;  %vm71_vm1 = vcmask 523264   ;;  %vm122_vm2 = vcmask 261120  }
   0x5   :  { %v225_v5 = vld [vmem:[%s328_s0] sm:$0xff]   ;;  %s254_s11 = smov [#allocation2]  }
   0x6   :  { %207 = vmatpush3.bf16.msra.mxu0 %v222_v2  ;;  %v196_v6 = vld [vmem:[%s331_s3] sm:$0xff]   ;;  %s175_s12 = sshll.u32 %s254_s11, 4  ;;  %s176_s12 = int_to_ptr.vmem [resolvable:$true] %s175_s12 }
   0x7   :  { %208 = vmatprep.subr.bf16.mxu0 %v252_v1  ;;  %v186_v7 = vld [vmem:[%s330_s2] ss:$0 sm:$0xff]  ;;  %v197_v8 = vunpack.c.l.bf16 %v196_v6  ;;  %v198_v13 = vunpack.c.h.bf16 %v196_v6  ;;  %s230_s13 = scalar_lea.vmem %s176_s12, 256  ;;  %p235_p1 = scmp.lt.s32.totalorder %s176_s12, %s176_s12 }
   0x8   :  { %v193_v37 = vld [vmem:[%s332_s4] ss:$0 sm:$0xff]  ;;  %p231_p0 = scmp.ne.s32.totalorder %s176_s12, %s230_s13  ;;  %p236_p2 = scmp.lt.s32.totalorder %s230_s13, %s230_s13 }
   0x9   :  { %v194_v39 = vld [vmem:[%s333_s5] ss:$0 sm:$0xff] }
   0xa   :  { %209 = vmatpush3.bf16.msra.mxu0 %v223_v3  ;;  %p237_p3 = por %p236_p2, %p235_p1 }
   0xb   :  { %210 = vmatprep.subr.bf16.mxu0 %v252_v1 }
   0xc   :  { %p238_p4 = pnand %p237_p3, %p231_p0 }
   0xe   :  { %211 = vmatpush3.bf16.msra.mxu0 %v224_v4 }
  0x11   :  { %213 = vmatmul.mubr.msk.bf16.vlgmr.msra.gmra.mxu0 %vm71_vm1, %v225_v5 }
  0xd1   :  { %v109_v9 = vpop.f32.mrf.mxu0 }
  0xd2   :  { %v110_v10 = vadd.f32 %v186_v7, %v109_v9 }
  0xd3   :  { %v214_v11 = vpop.f32.mrf.mxu0 }
  0xd4   :  { %v120_v12 = vadd.f32 %v197_v8, %v110_v10 }
  0xd5   :  { %v112_v14 = vpop.f32.mrf.mxu0 }
  0xd6   :  { %v113_v15 = vadd.f32 %v186_v7, %v112_v14  ;;  %v123_v16 = vsel %vm122_vm2, %v120_v12, 0.0 }
  0xd7   :  { %124 = vadd.xlane.f32.xlu0 %v123_v16  ;;  %v215_v17 = vpop.f32.mrf.mxu0 }
  0xd8   :  { %v121_v18 = vadd.f32 %v198_v13, %v113_v15 }
  0xda   :  { %v126_v19 = vsel %vm122_vm2, %v121_v18, 0.0 }
  0xdb   :  { %127 = vadd.xlane.f32.xlu0 %v126_v19 }
 0x160   :  { %v125_v20 = vpop.xlane.xlu0 %124 }
 0x161   :  { %v130_v21 = vmul.f32 0.03125, %v125_v20 }
 0x163   :  { %v132_v22 = vsub.f32 %v120_v12, %v130_v21 }
 0x164   :  { %v128_v23 = vpop.xlane.xlu0 %127 }
 0x165   :  { %v131_v24 = vmul.f32 0.03125, %v128_v23  ;;  %v134_v25 = vmul.f32 %v132_v22, %v132_v22 }
 0x167   :  { %v133_v26 = vsub.f32 %v121_v18, %v131_v24  ;;  %v136_v27 = vsel %vm122_vm2, %v134_v25, 0.0 }
 0x168   :  { %137 = vadd.xlane.f32.xlu1 %v136_v27 }
 0x169   :  { %v135_v28 = vmul.f32 %v133_v26, %v133_v26 }
 0x16b   :  { %v139_v29 = vsel %vm122_vm2, %v135_v28, 0.0 }
 0x16c   :  { %140 = vadd.xlane.f32.xlu1 %v139_v29 }
 0x1f1   :  { %v138_v30 = vpop.xlane.xlu1 %137 }
 0x1f2   :  { %v142_v31 = vmul.f32 0.03125, %v138_v30 }
 0x1f4   :  { %v144_v32 = vadd.f32 1e-05, %v142_v31 }
 0x1f5   :  { %v141_v33 = vpop.xlane.xlu1 %140 }
 0x1f6   :  { %226 = vrsqrt.f32 %v144_v32  ;;  %v143_v34 = vmul.f32 0.03125, %v141_v33 }
 0x1f8   :  { %v145_v35 = vadd.f32 1e-05, %v143_v34 }
 0x1fa   :  { %228 = vrsqrt.f32 %v145_v35 }
 0x203   :  { %v227_v36 = vpop.eup %226 }
 0x204   :  { %v148_v38 = vmul.f32 %v227_v36, %v132_v22 }
 0x206   :  { %v157_v40 = vmul.f32 %v193_v37, %v148_v38 }
 0x207   :  { %v229_v41 = vpop.eup %228 }
 0x208   :  { %v149_v42 = vmul.f32 %v229_v41, %v133_v26  ;;  %v166_v43 = vadd.f32 %v194_v39, %v157_v40 }
 0x20a   :  { %v158_v44 = vmul.f32 %v193_v37, %v149_v42  ;;  %168 = vst.msk [vmem:[#allocation2] sm:$0xff] %vm122_vm2, %v166_v43 }
 0x20c   :  { %v167_v45 = vadd.f32 %v194_v39, %v158_v44 }
 0x20e   :  { %169 = vst.msk [vmem:[#allocation2 + $0x8] sm:$0xff] %vm122_vm2, %v167_v45 }
 0x20f   :  { %241 = shalt.err (!%p238_p4)
}
 0x210   :  { %s255_s4 = smov 128   ;;  %s256_s5 = smov 8  }
 0x211   :  { %181 = dma.vmem_to_hbm [thread:$0]  %s176_s12, 256, %s334_s6, [#allocation3], %s255_s4, %s255_s4, %s256_s5  }
 0x212   :  { %250 = dma.done.wait [#allocation3], 256  }
 0x213   :  { %251 = vsyncadd [#allocation3], 4294967040 }
 0x214   :  { %185 = vsyncpa [#allocation3], 1 }

</bundles_post_ra>
